<compile_context>
chip_gen: v7x
topology: tpu7x:2x2x1
jax: 0.10.0
libtpu: 0.0.40
codegen_flags: <defaults>
</compile_context>

<pallas_src>
import jax
import jax.numpy as jnp
from jax.experimental import pallas as pl
from jax.experimental.pallas import tpu as pltpu

LANE = 128   # lane tile
SUB = 8      # sublane tile


def _ceil_to(x, m):
    return ((x + m - 1) // m) * m


def _pad2(x, rows, cols):
    x = x.astype(jnp.float32)
    return jnp.pad(x, ((0, rows - x.shape[0]), (0, cols - x.shape[1])))


def _fuse_gru_weights(wih, whh, bih, bhh, kx_pad, h_pad):
    """Build the single fused GRU matmul operand.

    Inputs follow the (in_dim, 3H) transposed PyTorch GRUCell layout, gate order r,z,n.
    Returns
      W : (kx_pad + h_pad, 4*h_pad)  column blocks = [ r | z | gx_n | gh_n ]
      b : (1, 4*h_pad)
    so  g = [x | h] @ W + b  yields r/z already summed over x and h, while the n-gate
    keeps gx_n and gh_n separate (needed for r * gh_n).  Each gate block starts at a
    multiple of 128 lanes -> in-kernel gate slices are lane-tile aligned.
    """
    f32 = jnp.float32
    kx, three_h = wih.shape
    h = three_h // 3
    wih, whh = wih.astype(f32), whh.astype(f32)
    bih, bhh = bih.astype(f32), bhh.astype(f32)
    W = jnp.zeros((kx_pad + h_pad, 4 * h_pad), f32)
    b = jnp.zeros((1, 4 * h_pad), f32)
    # r gate
    W = W.at[:kx, 0:h].set(wih[:, 0:h])
    W = W.at[kx_pad:kx_pad + h, 0:h].set(whh[:, 0:h])
    b = b.at[:, 0:h].set(bih[:, 0:h] + bhh[:, 0:h])
    # z gate
    W = W.at[:kx, h_pad:h_pad + h].set(wih[:, h:2 * h])
    W = W.at[kx_pad:kx_pad + h, h_pad:h_pad + h].set(whh[:, h:2 * h])
    b = b.at[:, h_pad:h_pad + h].set(bih[:, h:2 * h] + bhh[:, h:2 * h])
    # gx_n (x contribution only)
    W = W.at[:kx, 2 * h_pad:2 * h_pad + h].set(wih[:, 2 * h:3 * h])
    b = b.at[:, 2 * h_pad:2 * h_pad + h].set(bih[:, 2 * h:3 * h])
    # gh_n (h contribution only)
    W = W.at[kx_pad:kx_pad + h, 3 * h_pad:3 * h_pad + h].set(whh[:, 2 * h:3 * h])
    b = b.at[:, 3 * h_pad:3 * h_pad + h].set(bhh[:, 2 * h:3 * h])
    return W, b


# ----------------------------------------------------------------------------
# Kernel (grid = (T,), "arbitrary"; weights resident; hidden carried in hout block)
# ----------------------------------------------------------------------------
def _decoder_kernel(
    # per-step input
    emb_ref,                                   # (Bp, Ip)
    # resident inputs
    hinit_ref, maskb_ref, ctx_ref,             # (Bp,Hp), (Bp,S), (Bp,S,Cp)
    w1_ref, b1_ref, w2_ref, b2_ref,            # fused GRUs
    ws2s_ref, bs2s_ref, wh2s_ref, bh2s_ref, wa2o_ref,   # attention
    we_ref, whc_ref, bout_ref,                 # readout
    # outputs
    out_ref,                                   # (Bp, Rp) per-step block
    hout_ref,                                  # (Bp, Hp) resident (carried state)
    # scratch
    satt_ref,                                  # (Bp, S, Ap) cached s2s(context)
):
    f32 = jnp.float32
    Bp, Hp = hout_ref.shape
    S = maskb_ref.shape[1]
    Cp = ctx_ref.shape[2]
    t = pl.program_id(0)

    @pl.when(t == 0)
    def _init():
        # carried hidden state lives in the VMEM-resident output block
        hout_ref[...] = hinit_ref[...]
        # encoder-side projection is timestep-invariant: compute once, cache in scratch.
        # (Bp*S merge keeps (8,128) tiles intact since S is a multiple of 8.)
        ctx2 = ctx_ref[...].reshape(Bp * S, Cp)
        s = jnp.dot(ctx2, ws2s_ref[...], preferred_element_type=f32) + bs2s_ref[...]
        satt_ref[...] = s.reshape(Bp, S, -1)

    emb = emb_ref[...]
    h0 = hout_ref[...]
    ctx = ctx_ref[...]

    def fused_gru(xh, h, w_ref, b_ref):
        # one (Bp, Kx+Hp) @ (Kx+Hp, 4Hp) matmul; gate blocks are 128-lane aligned:
        #   [ r | z | gx_n | gh_n ]
        g = jnp.dot(xh, w_ref[...], preferred_element_type=f32) + b_ref[...]
        r = jax.nn.sigmoid(g[:, 0:Hp])
        z = jax.nn.sigmoid(g[:, Hp:2 * Hp])
        n = jnp.tanh(g[:, 2 * Hp:3 * Hp] + r * g[:, 3 * Hp:4 * Hp])
        return (1.0 - z) * n + z * h

    # readout contribution that only depends on emb — independent of gru/attention,
    # so the scheduler can overlap it.
    ro_emb = jnp.dot(emb, we_ref[...], preferred_element_type=f32)

    # --- gru1 ---------------------------------------------------------------
    h1 = fused_gru(jnp.concatenate([emb, h0], axis=1), h0, w1_ref, b1_ref)

    # --- attention ----------------------------------------------------------
    h_att = jnp.dot(h1, wh2s_ref[...], preferred_element_type=f32) + bh2s_ref[...]
    attn_h = jnp.tanh(satt_ref[...] + h_att[:, None, :])
    # a2o: (1, Ap) weight -> multiply + lane reduce; its bias cancels in softmax.
    logit = jnp.sum(attn_h * wa2o_ref[...], axis=-1) + maskb_ref[...]      # (Bp, S)
    m = jnp.max(logit, axis=1, keepdims=True)
    e = jnp.exp(logit - m)
    softmax = e / jnp.sum(e, axis=1, keepdims=True)
    attn_enc = jnp.sum(softmax[:, :, None] * ctx, axis=1)                  # (Bp, Cp)

    # --- gru2 ---------------------------------------------------------------
    h2 = fused_gru(jnp.concatenate([attn_enc, h1], axis=1), h1, w2_ref, b2_ref)

    # --- readout ------------------------------------------------------------
    hc = jnp.concatenate([h2, attn_enc], axis=1)
    ro = ro_emb + jnp.dot(hc, whc_ref[...], preferred_element_type=f32) + bout_ref[...]
    # TODO(synk): nn.Dropout(readout_dropout) — eval-mode identity here; training-mode
    #             stochastic dropout (pltpu.prng_seed / prng_random_bits) not implemented.
    out_ref[...] = jnp.tanh(ro)
    hout_ref[...] = h2


# ----------------------------------------------------------------------------
# Wrapper
# ----------------------------------------------------------------------------
def _decoder_seq_impl(emb_seq, hidden, enc_mask, enc_context, p):
    f32 = jnp.float32
    T, B, ninp = emb_seq.shape
    nhid = hidden.shape[1]
    _, S, C = enc_context.shape
    natt = p["ws2s"].shape[1]
    nread = p["we"].shape[1]

    Bp = _ceil_to(B, SUB)
    Ip = _ceil_to(ninp, LANE)
    Hp = _ceil_to(nhid, LANE)
    Cp = _ceil_to(C, LANE)
    Ap = _ceil_to(natt, LANE)
    Rp = _ceil_to(nread, LANE)

    # ---- activations, zero-padded to sublane/lane tiles ----
    emb_p = jnp.pad(emb_seq.astype(f32), ((0, 0), (0, Bp - B), (0, Ip - ninp)))
    hid_p = _pad2(hidden, Bp, Hp)
    ctx_p = jnp.pad(enc_context.astype(f32), ((0, Bp - B), (0, 0), (0, Cp - C)))

    # mask -> finite additive bias (equals masked_fill(-inf) after softmax; no NaN for
    # fully-masked rows; torch's "only mask if mask.any()" handled here, outside the kernel)
    any_mask = jnp.any(enc_mask > 0)
    mask_bias = jnp.where(any_mask,
                          (1.0 - enc_mask.astype(f32)) * jnp.float32(-1e30),
                          jnp.zeros_like(enc_mask, dtype=f32))
    mask_bias = jnp.pad(mask_bias, ((0, Bp - B), (0, 0)))

    # ---- fused / padded weights ----
    w1, b1 = _fuse_gru_weights(p["wih1"], p["whh1"], p["bih1"], p["bhh1"], Ip, Hp)
    w2, b2 = _fuse_gru_weights(p["wih2"], p["whh2"], p["bih2"], p["bhh2"], Cp, Hp)
    ws2s = _pad2(p["ws2s"], Cp, Ap)
    bs2s = _pad2(p["bs2s"], 1, Ap)
    wh2s = _pad2(p["wh2s"], Hp, Ap)
    bh2s = _pad2(p["bh2s"], 1, Ap)
    wa2o = _pad2(p["wa2o"], 1, Ap)          # a2o bias dropped (shift-invariant in softmax)
    we = _pad2(p["we"], Ip, Rp)
    whc = jnp.zeros((Hp + Cp, Rp), f32)
    whc = whc.at[:nhid, :nread].set(p["who"].astype(f32))
    whc = whc.at[Hp:Hp + C, :nread].set(p["wc"].astype(f32))
    bout = _pad2(p["be"] + p["bho"] + p["bc"], 1, Rp)
    # NOTE(v6e/v7x): casting matmul inputs to bf16 (keeping preferred_element_type=f32)
    # is the next lever at realistic sizes; kept f32 here for tight parity with the
    # f32 reference.

    operands = (emb_p, hid_p, mask_bias, ctx_p, w1, b1, w2, b2,
                ws2s, bs2s, wh2s, bh2s, wa2o, we, whc, bout)

    def _const_spec(x):
        return pl.BlockSpec(x.shape, lambda t, _nd=x.ndim: (0,) * _nd)

    in_specs = [pl.BlockSpec((None, Bp, Ip), lambda t: (t, 0, 0))]
    in_specs += [_const_spec(x) for x in operands[1:]]

    out_specs = (pl.BlockSpec((None, Bp, Rp), lambda t: (t, 0, 0)),
                 pl.BlockSpec((Bp, Hp), lambda t: (0, 0)))
    out_shape = (jax.ShapeDtypeStruct((T, Bp, Rp), f32),
                 jax.ShapeDtypeStruct((Bp, Hp), f32))

    per_step_flops = 2 * Bp * ((Ip + Hp) * 4 * Hp + (Cp + Hp) * 4 * Hp + Hp * Ap
                               + S * Ap + S * Cp + Ip * Rp + (Hp + Cp) * Rp)
    cost = pl.CostEstimate(
        flops=T * per_step_flops + 2 * Bp * S * Cp * Ap,
        transcendentals=T * Bp * (6 * Hp + S * Ap + S + Rp),
        bytes_accessed=4 * (sum(int(x.size) for x in operands) + T * Bp * Rp + Bp * Hp),
    )

    out_p, h_p = pl.pallas_call(
        _decoder_kernel,
        grid=(T,),
        in_specs=in_specs,
        out_specs=out_specs,
        out_shape=out_shape,
        scratch_shapes=[pltpu.VMEM((Bp, S, Ap), f32)],
        compiler_params=pltpu.CompilerParams(dimension_semantics=("arbitrary",)),
        cost_estimate=cost,
    )(*operands)

    return out_p[:, :B, :nread], h_p[:B, :nhid]


@jax.jit
def vallina_decoder_pallas(emb, hidden, enc_mask, enc_context, params):
    """Single-step forward, matching VallinaDecoder.forward(emb, hidden, enc_mask, enc_context)."""
    out_seq, h = _decoder_seq_impl(emb[None], hidden, enc_mask, enc_context, params)
    return out_seq[0], h


@jax.jit
def vallina_decoder_pallas_seq(emb_seq, hidden, enc_mask, enc_context, params):
    """Teacher-forced multi-step decode: emb_seq (T,B,ninp) -> ((T,B,nreadout), final hidden)."""
    return _decoder_seq_impl(emb_seq, hidden, enc_mask, enc_context, params)


# ----------------------------------------------------------------------------
# Pure-JAX reference (same math as the PyTorch module)
# ----------------------------------------------------------------------------
def vallina_decoder_ref(emb, hidden, enc_mask, enc_context, p):
    H = hidden.shape[1]

    def gru_cell(x, h, wih, whh, bih, bhh):
        gx = x @ wih + bih
        gh = h @ whh + bhh
        r = jax.nn.sigmoid(gx[:, 0:H] + gh[:, 0:H])
        z = jax.nn.sigmoid(gx[:, H:2 * H] + gh[:, H:2 * H])
        n = jnp.tanh(gx[:, 2 * H:] + r * gh[:, 2 * H:])
        return (1.0 - z) * n + z * h

    h1 = gru_cell(emb, hidden, p["wih1"], p["whh1"], p["bih1"], p["bhh1"])
    B, S, C = enc_context.shape
    s_att = (enc_context.reshape(B * S, C) @ p["ws2s"] + p["bs2s"]).reshape(B, S, -1)
    h_att = h1 @ p["wh2s"] + p["bh2s"]
    attn_h = jnp.tanh(s_att + h_att[:, None, :])
    logit = jnp.sum(attn_h * p["wa2o"][None, :, :], axis=-1) + p["ba2o"]
    any_mask = jnp.any(enc_mask > 0.0)
    logit = jnp.where(any_mask, jnp.where(enc_mask > 0.0, logit, -jnp.inf), logit)
    softmax = jax.nn.softmax(logit, axis=1)
    attn_enc = jnp.sum(softmax[:, :, None] * enc_context, axis=1)
    h2 = gru_cell(attn_enc, h1, p["wih2"], p["whh2"], p["bih2"], p["bhh2"])
    out = jnp.tanh(emb @ p["we"] + p["be"] + h2 @ p["who"] + p["bho"]
                   + attn_enc @ p["wc"] + p["bc"])
    return out, h2


def vallina_decoder_ref_seq(emb_seq, hidden, enc_mask, enc_context, p):
    outs, h = [], hidden
    for t in range(emb_seq.shape[0]):
        o, h = vallina_decoder_ref(emb_seq[t], h, enc_mask, enc_context, p)
        outs.append(o)
    return jnp.stack(outs), h


# ----------------------------------------------------------------------------
# Main
# ----------------------------------------------------------------------------
if __name__ == "__main__":
    B, S, T = 2, 8, 4
    ninp, nhid, enc_ncontext, natt, nreadout = 32, 32, 32, 32, 32

    key = jax.random.PRNGKey(0)
    keys = jax.random.split(key, 24)
    ki = iter(range(24))

    def rnd(shape, scale=0.1):
        return (scale * jax.random.normal(keys[next(ki)], shape)).astype(jnp.float32)

    # activations
    emb_seq = rnd((T, B, ninp), 1.0)
    hidden = rnd((B, nhid), 1.0)
    enc_context = rnd((B, S, enc_ncontext), 1.0)
    lengths = jnp.array([S, 5], dtype=jnp.int32)
    enc_mask = (jnp.arange(S)[None, :] < lengths[:, None]).astype(jnp.float32)

    # parameters: weights stored as (in_dim, out_dim), GRU gate order r,z,n, biases (1,out)
    params = {
        "wih1": rnd((ninp, 3 * nhid)), "whh1": rnd((nhid, 3 * nhid)),
        "bih1": rnd((1, 3 * nhid)), "bhh1": rnd((1, 3 * nhid)),
        "wih2": rnd((enc_ncontext, 3 * nhid)), "whh2": rnd((nhid, 3 * nhid)),
        "bih2": rnd((1, 3 * nhid)), "bhh2": rnd((1, 3 * nhid)),
        "ws2s": rnd((enc_ncontext, natt)), "bs2s": rnd((1, natt)),
        "wh2s": rnd((nhid, natt)), "bh2s": rnd((1, natt)),
        "wa2o": rnd((1, natt)), "ba2o": rnd((1, 1)),
        "we": rnd((ninp, nreadout)), "be": rnd((1, nreadout)),
        "who": rnd((nhid, nreadout)), "bho": rnd((1, nreadout)),
        "wc": rnd((enc_ncontext, nreadout)), "bc": rnd((1, nreadout)),
    }

    # --- single-step (matches VallinaDecoder.forward) ------------------------
    out, h_out = vallina_decoder_pallas(emb_seq[0], hidden, enc_mask, enc_context, params)
    jax.block_until_ready((out, h_out))
    out_ref, h_ref = vallina_decoder_ref(emb_seq[0], hidden, enc_mask, enc_context, params)
    assert out.shape == (B, nreadout) and h_out.shape == (B, nhid)
    assert jnp.allclose(out, out_ref, atol=3e-5, rtol=1e-4)
    assert jnp.allclose(h_out, h_ref, atol=3e-5, rtol=1e-4)

    # --- multi-step (grid over T, hidden carried in VMEM) --------------------
    outs, h_T = vallina_decoder_pallas_seq(emb_seq, hidden, enc_mask, enc_context, params)
    jax.block_until_ready((outs, h_T))
    outs_ref, h_T_ref = vallina_decoder_ref_seq(emb_seq, hidden, enc_mask, enc_context, params)
    assert outs.shape == (T, B, nreadout) and h_T.shape == (B, nhid)
    assert jnp.allclose(outs, outs_ref, atol=1e-4, rtol=1e-4)
    assert jnp.allclose(h_T, h_T_ref, atol=1e-4, rtol=1e-4)

    print("KERNEL_OK")
</pallas_src>

<mosaic_0001>
module attributes {stable_mosaic.version = 11 : i64} {
  func.func @_decoder_kernel(%arg0: i32, %arg1: memref<1x8x128xf32, #tpu.memory_space<vmem>>, %arg2: memref<8x128xf32, #tpu.memory_space<vmem>>, %arg3: memref<8x8xf32, #tpu.memory_space<vmem>>, %arg4: memref<8x8x128xf32, #tpu.memory_space<vmem>>, %arg5: memref<256x512xf32, #tpu.memory_space<vmem>>, %arg6: memref<1x512xf32, #tpu.memory_space<vmem>>, %arg7: memref<256x512xf32, #tpu.memory_space<vmem>>, %arg8: memref<1x512xf32, #tpu.memory_space<vmem>>, %arg9: memref<128x128xf32, #tpu.memory_space<vmem>>, %arg10: memref<1x128xf32, #tpu.memory_space<vmem>>, %arg11: memref<128x128xf32, #tpu.memory_space<vmem>>, %arg12: memref<1x128xf32, #tpu.memory_space<vmem>>, %arg13: memref<1x128xf32, #tpu.memory_space<vmem>>, %arg14: memref<128x128xf32, #tpu.memory_space<vmem>>, %arg15: memref<256x128xf32, #tpu.memory_space<vmem>>, %arg16: memref<1x128xf32, #tpu.memory_space<vmem>>, %arg17: memref<1x8x128xf32, #tpu.memory_space<vmem>>, %arg18: memref<8x128xf32, #tpu.memory_space<vmem>>, %arg19: memref<8x8x128xf32, #tpu.memory_space<vmem>>) attributes {dimension_semantics = [#tpu.dimension_semantics<arbitrary>], iteration_bounds = array<i64: 1>, scalar_prefetch = 0 : i64, scratch_operands = 1 : i64, tpu.core_type = #tpu.core_type<tc>, window_params = [{transform_indices = @transform_0, window_bounds = array<i64: 1, 8, 128>}, {pipeline_mode = #tpu.pipeline_mode<synchronous>, transform_indices = @transform_1, window_bounds = array<i64: 8, 128>}, {pipeline_mode = #tpu.pipeline_mode<synchronous>, transform_indices = @transform_2, window_bounds = array<i64: 8, 8>}, {pipeline_mode = #tpu.pipeline_mode<synchronous>, transform_indices = @transform_3, window_bounds = array<i64: 8, 8, 128>}, {pipeline_mode = #tpu.pipeline_mode<synchronous>, transform_indices = @transform_4, window_bounds = array<i64: 256, 512>}, {pipeline_mode = #tpu.pipeline_mode<synchronous>, transform_indices = @transform_5, window_bounds = array<i64: 1, 512>}, {pipeline_mode = #tpu.pipeline_mode<synchronous>, transform_indices = @transform_6, window_bounds = array<i64: 256, 512>}, {pipeline_mode = #tpu.pipeline_mode<synchronous>, transform_indices = @transform_7, window_bounds = array<i64: 1, 512>}, {pipeline_mode = #tpu.pipeline_mode<synchronous>, transform_indices = @transform_8, window_bounds = array<i64: 128, 128>}, {pipeline_mode = #tpu.pipeline_mode<synchronous>, transform_indices = @transform_9, window_bounds = array<i64: 1, 128>}, {pipeline_mode = #tpu.pipeline_mode<synchronous>, transform_indices = @transform_10, window_bounds = array<i64: 128, 128>}, {pipeline_mode = #tpu.pipeline_mode<synchronous>, transform_indices = @transform_11, window_bounds = array<i64: 1, 128>}, {pipeline_mode = #tpu.pipeline_mode<synchronous>, transform_indices = @transform_12, window_bounds = array<i64: 1, 128>}, {pipeline_mode = #tpu.pipeline_mode<synchronous>, transform_indices = @transform_13, window_bounds = array<i64: 128, 128>}, {pipeline_mode = #tpu.pipeline_mode<synchronous>, transform_indices = @transform_14, window_bounds = array<i64: 256, 128>}, {pipeline_mode = #tpu.pipeline_mode<synchronous>, transform_indices = @transform_15, window_bounds = array<i64: 1, 128>}, {transform_indices = @transform_16, window_bounds = array<i64: 1, 8, 128>}, {pipeline_mode = #tpu.pipeline_mode<synchronous>, transform_indices = @transform_17, window_bounds = array<i64: 8, 128>}]} {
    %c0_i32 = arith.constant 0 : i32
    %0 = arith.cmpi eq, %arg0, %c0_i32 : i32
    %1 = arith.extui %0 : i1 to i32
    %c0_i32_0 = arith.constant 0 : i32
    %2 = arith.cmpi ne, %1, %c0_i32_0 : i32
    scf.if %2 {
      %c0_52 = arith.constant 0 : index
      %c0_53 = arith.constant 0 : index
      %107 = vector.load %arg2[%c0_52, %c0_53] : memref<8x128xf32, #tpu.memory_space<vmem>>, vector<8x128xf32>
      %c0_54 = arith.constant 0 : index
      %c0_55 = arith.constant 0 : index
      %108 = vector.load %arg18[%c0_54, %c0_55] : memref<8x128xf32, #tpu.memory_space<vmem>>, vector<8x128xf32>
      tpu.vector_store %arg18[%c0_54, %c0_55], %107 {strides = array<i32>} : memref<8x128xf32, #tpu.memory_space<vmem>>, vector<8x128xf32>,
      %c0_56 = arith.constant 0 : index
      %c0_57 = arith.constant 0 : index
      %c0_58 = arith.constant 0 : index
      %109 = vector.load %arg4[%c0_56, %c0_57, %c0_58] : memref<8x8x128xf32, #tpu.memory_space<vmem>>, vector<8x8x128xf32>
      %110 = vector.shape_cast %109 : vector<8x8x128xf32> to vector<64x128xf32>
      %c0_59 = arith.constant 0 : index
      %c0_60 = arith.constant 0 : index
      %111 = vector.load %arg9[%c0_59, %c0_60] : memref<128x128xf32, #tpu.memory_space<vmem>>, vector<128x128xf32>
      %cst_61 = arith.constant dense<0.000000e+00> : vector<64x128xf32>
      %112 = tpu.matmul %110, %111, %cst_61 {dimension_numbers = #tpu.dot_dimension_numbers<[1], [0], [0], [1], [0, 0, 1, 1], [], []>} : vector<64x128xf32>, vector<128x128xf32>, vector<64x128xf32> -> vector<64x128xf32>
      %c0_62 = arith.constant 0 : index
      %c0_63 = arith.constant 0 : index
      %113 = vector.load %arg10[%c0_62, %c0_63] : memref<1x128xf32, #tpu.memory_space<vmem>>, vector<1x128xf32>
      %114 = vector.broadcast %113 : vector<1x128xf32> to vector<64x128xf32>
      %115 = arith.addf %112, %114 : vector<64x128xf32>
      %116 = vector.shape_cast %115 : vector<64x128xf32> to vector<8x8x128xf32>
      %c0_64 = arith.constant 0 : index
      %c0_65 = arith.constant 0 : index
      %c0_66 = arith.constant 0 : index
      %117 = vector.load %arg19[%c0_64, %c0_65, %c0_66] : memref<8x8x128xf32, #tpu.memory_space<vmem>>, vector<8x8x128xf32>
      tpu.vector_store %arg19[%c0_64, %c0_65, %c0_66], %116 {strides = array<i32>} : memref<8x8x128xf32, #tpu.memory_space<vmem>>, vector<8x8x128xf32>,
    } else {
    }
    %c0 = arith.constant 0 : index
    %c0_1 = arith.constant 0 : index
    %c0_2 = arith.constant 0 : index
    %3 = vector.load %arg1[%c0, %c0_1, %c0_2] : memref<1x8x128xf32, #tpu.memory_space<vmem>>, vector<1x8x128xf32>
    %4 = vector.shape_cast %3 : vector<1x8x128xf32> to vector<8x128xf32>
    %c0_3 = arith.constant 0 : index
    %c0_4 = arith.constant 0 : index
    %5 = vector.load %arg18[%c0_3, %c0_4] : memref<8x128xf32, #tpu.memory_space<vmem>>, vector<8x128xf32>
    %c0_5 = arith.constant 0 : index
    %c0_6 = arith.constant 0 : index
    %c0_7 = arith.constant 0 : index
    %6 = vector.load %arg4[%c0_5, %c0_6, %c0_7] : memref<8x8x128xf32, #tpu.memory_space<vmem>>, vector<8x8x128xf32>
    %c0_8 = arith.constant 0 : index
    %c0_9 = arith.constant 0 : index
    %7 = vector.load %arg14[%c0_8, %c0_9] : memref<128x128xf32, #tpu.memory_space<vmem>>, vector<128x128xf32>
    %cst = arith.constant dense<0.000000e+00> : vector<8x128xf32>
    %8 = tpu.matmul %4, %7, %cst {dimension_numbers = #tpu.dot_dimension_numbers<[1], [0], [0], [1], [0, 0, 1, 1], [], []>} : vector<8x128xf32>, vector<128x128xf32>, vector<8x128xf32> -> vector<8x128xf32>
    %9 = tpu.concatenate %4, %5 in 1 : vector<8x128xf32>, vector<8x128xf32> -> vector<8x256xf32>
    %c0_10 = arith.constant 0 : index
    %c0_11 = arith.constant 0 : index
    %10 = vector.load %arg5[%c0_10, %c0_11] : memref<256x512xf32, #tpu.memory_space<vmem>>, vector<256x512xf32>
    %cst_12 = arith.constant dense<0.000000e+00> : vector<8x512xf32>
    %11 = tpu.matmul %9, %10, %cst_12 {dimension_numbers = #tpu.dot_dimension_numbers<[1], [0], [0], [1], [0, 0, 1, 1], [], []>} : vector<8x256xf32>, vector<256x512xf32>, vector<8x512xf32> -> vector<8x512xf32>
    %c0_13 = arith.constant 0 : index
    %c0_14 = arith.constant 0 : index
    %12 = vector.load %arg6[%c0_13, %c0_14] : memref<1x512xf32, #tpu.memory_space<vmem>>, vector<1x512xf32>
    %13 = vector.broadcast %12 : vector<1x512xf32> to vector<8x512xf32>
    %14 = arith.addf %11, %13 : vector<8x512xf32>
    %15 = vector.extract_strided_slice %14 {offsets = [0, 0], sizes = [8, 128], strides = [1, 1]} : vector<8x512xf32> to vector<8x128xf32>
    %16 = arith.negf %15 : vector<8x128xf32>
    %17 = math.exp %16 : vector<8x128xf32>
    %cst_15 = arith.constant 1.000000e+00 : f32
    %18 = vector.broadcast %cst_15 : f32 to vector<8x128xf32>
    %19 = arith.addf %18, %17 : vector<8x128xf32>
    %20 = arith.divf %18, %19 : vector<8x128xf32>
    %21 = vector.extract_strided_slice %14 {offsets = [0, 128], sizes = [8, 128], strides = [1, 1]} : vector<8x512xf32> to vector<8x128xf32>
    %22 = arith.negf %21 : vector<8x128xf32>
    %23 = math.exp %22 : vector<8x128xf32>
    %cst_16 = arith.constant 1.000000e+00 : f32
    %24 = vector.broadcast %cst_16 : f32 to vector<8x128xf32>
    %25 = arith.addf %24, %23 : vector<8x128xf32>
    %26 = arith.divf %24, %25 : vector<8x128xf32>
    %27 = vector.extract_strided_slice %14 {offsets = [0, 256], sizes = [8, 128], strides = [1, 1]} : vector<8x512xf32> to vector<8x128xf32>
    %28 = vector.extract_strided_slice %14 {offsets = [0, 384], sizes = [8, 128], strides = [1, 1]} : vector<8x512xf32> to vector<8x128xf32>
    %29 = arith.mulf %20, %28 : vector<8x128xf32>
    %30 = arith.addf %27, %29 : vector<8x128xf32>
    %31 = math.tanh %30 : vector<8x128xf32>
    %cst_17 = arith.constant 1.000000e+00 : f32
    %32 = vector.broadcast %cst_17 : f32 to vector<8x128xf32>
    %33 = arith.subf %32, %26 : vector<8x128xf32>
    %34 = arith.mulf %33, %31 : vector<8x128xf32>
    %35 = arith.mulf %26, %5 : vector<8x128xf32>
    %36 = arith.addf %34, %35 : vector<8x128xf32>
    %c0_18 = arith.constant 0 : index
    %c0_19 = arith.constant 0 : index
    %37 = vector.load %arg11[%c0_18, %c0_19] : memref<128x128xf32, #tpu.memory_space<vmem>>, vector<128x128xf32>
    %cst_20 = arith.constant dense<0.000000e+00> : vector<8x128xf32>
    %38 = tpu.matmul %36, %37, %cst_20 {dimension_numbers = #tpu.dot_dimension_numbers<[1], [0], [0], [1], [0, 0, 1, 1], [], []>} : vector<8x128xf32>, vector<128x128xf32>, vector<8x128xf32> -> vector<8x128xf32>
    %c0_21 = arith.constant 0 : index
    %c0_22 = arith.constant 0 : index
    %39 = vector.load %arg12[%c0_21, %c0_22] : memref<1x128xf32, #tpu.memory_space<vmem>>, vector<1x128xf32>
    %40 = vector.broadcast %39 : vector<1x128xf32> to vector<8x128xf32>
    %41 = arith.addf %38, %40 : vector<8x128xf32>
    %c0_23 = arith.constant 0 : index
    %c0_24 = arith.constant 0 : index
    %c0_25 = arith.constant 0 : index
    %42 = vector.load %arg19[%c0_23, %c0_24, %c0_25] : memref<8x8x128xf32, #tpu.memory_space<vmem>>, vector<8x8x128xf32>
    %43 = vector.shape_cast %41 : vector<8x128xf32> to vector<8x1x128xf32>
    %44 = vector.broadcast %43 : vector<8x1x128xf32> to vector<8x8x128xf32>
    %45 = arith.addf %42, %44 : vector<8x8x128xf32>
    %46 = math.tanh %45 : vector<8x8x128xf32>
    %c0_26 = arith.constant 0 : index
    %c0_27 = arith.constant 0 : index
    %47 = vector.load %arg13[%c0_26, %c0_27] : memref<1x128xf32, #tpu.memory_space<vmem>>, vector<1x128xf32>
    %48 = vector.shape_cast %47 : vector<1x128xf32> to vector<1x1x128xf32>
    %49 = vector.broadcast %48 : vector<1x1x128xf32> to vector<8x8x128xf32>
    %50 = arith.mulf %46, %49 : vector<8x8x128xf32>
    %cst_28 = arith.constant dense<0.000000e+00> : vector<8x8xf32>
    %51 = vector.multi_reduction <add>, %50, %cst_28 [2] : vector<8x8x128xf32> to vector<8x8xf32>
    %c0_29 = arith.constant 0 : index
    %c0_30 = arith.constant 0 : index
    %52 = vector.load %arg3[%c0_29, %c0_30] : memref<8x8xf32, #tpu.memory_space<vmem>>, vector<8x8xf32>
    %53 = arith.addf %51, %52 : vector<8x8xf32>
    %cst_31 = arith.constant dense<0xFF800000> : vector<8xf32>
    %54 = vector.multi_reduction <maximumf>, %53, %cst_31 [1] : vector<8x8xf32> to vector<8xf32>
    %55 = vector.shape_cast %54 : vector<8xf32> to vector<8x1xf32>
    %56 = vector.broadcast %55 : vector<8x1xf32> to vector<8x8xf32>
    %57 = arith.subf %53, %56 : vector<8x8xf32>
    %58 = math.exp %57 : vector<8x8xf32>
    %cst_32 = arith.constant dense<0.000000e+00> : vector<8xf32>
    %59 = vector.multi_reduction <add>, %58, %cst_32 [1] : vector<8x8xf32> to vector<8xf32>
    %60 = vector.shape_cast %59 : vector<8xf32> to vector<8x1xf32>
    %61 = vector.broadcast %60 : vector<8x1xf32> to vector<8x8xf32>
    %62 = arith.divf %58, %61 : vector<8x8xf32>
    %63 = vector.shape_cast %62 : vector<8x8xf32> to vector<8x8x1xf32>
    %64 = vector.broadcast %63 : vector<8x8x1xf32> to vector<8x8x128xf32>
    %65 = arith.mulf %64, %6 : vector<8x8x128xf32>
    %cst_33 = arith.constant dense<0.000000e+00> : vector<8x128xf32>
    %66 = vector.multi_reduction <add>, %65, %cst_33 [1] : vector<8x8x128xf32> to vector<8x128xf32>
    %67 = tpu.concatenate %66, %36 in 1 : vector<8x128xf32>, vector<8x128xf32> -> vector<8x256xf32>
    %c0_34 = arith.constant 0 : index
    %c0_35 = arith.constant 0 : index
    %68 = vector.load %arg7[%c0_34, %c0_35] : memref<256x512xf32, #tpu.memory_space<vmem>>, vector<256x512xf32>
    %cst_36 = arith.constant dense<0.000000e+00> : vector<8x512xf32>
    %69 = tpu.matmul %67, %68, %cst_36 {dimension_numbers = #tpu.dot_dimension_numbers<[1], [0], [0], [1], [0, 0, 1, 1], [], []>} : vector<8x256xf32>, vector<256x512xf32>, vector<8x512xf32> -> vector<8x512xf32>
    %c0_37 = arith.constant 0 : index
    %c0_38 = arith.constant 0 : index
    %70 = vector.load %arg8[%c0_37, %c0_38] : memref<1x512xf32, #tpu.memory_space<vmem>>, vector<1x512xf32>
    %71 = vector.broadcast %70 : vector<1x512xf32> to vector<8x512xf32>
    %72 = arith.addf %69, %71 : vector<8x512xf32>
    %73 = vector.extract_strided_slice %72 {offsets = [0, 0], sizes = [8, 128], strides = [1, 1]} : vector<8x512xf32> to vector<8x128xf32>
    %74 = arith.negf %73 : vector<8x128xf32>
    %75 = math.exp %74 : vector<8x128xf32>
    %cst_39 = arith.constant 1.000000e+00 : f32
    %76 = vector.broadcast %cst_39 : f32 to vector<8x128xf32>
    %77 = arith.addf %76, %75 : vector<8x128xf32>
    %78 = arith.divf %76, %77 : vector<8x128xf32>
    %79 = vector.extract_strided_slice %72 {offsets = [0, 128], sizes = [8, 128], strides = [1, 1]} : vector<8x512xf32> to vector<8x128xf32>
    %80 = arith.negf %79 : vector<8x128xf32>
    %81 = math.exp %80 : vector<8x128xf32>
    %cst_40 = arith.constant 1.000000e+00 : f32
    %82 = vector.broadcast %cst_40 : f32 to vector<8x128xf32>
    %83 = arith.addf %82, %81 : vector<8x128xf32>
    %84 = arith.divf %82, %83 : vector<8x128xf32>
    %85 = vector.extract_strided_slice %72 {offsets = [0, 256], sizes = [8, 128], strides = [1, 1]} : vector<8x512xf32> to vector<8x128xf32>
    %86 = vector.extract_strided_slice %72 {offsets = [0, 384], sizes = [8, 128], strides = [1, 1]} : vector<8x512xf32> to vector<8x128xf32>
    %87 = arith.mulf %78, %86 : vector<8x128xf32>
    %88 = arith.addf %85, %87 : vector<8x128xf32>
    %89 = math.tanh %88 : vector<8x128xf32>
    %cst_41 = arith.constant 1.000000e+00 : f32
    %90 = vector.broadcast %cst_41 : f32 to vector<8x128xf32>
    %91 = arith.subf %90, %84 : vector<8x128xf32>
    %92 = arith.mulf %91, %89 : vector<8x128xf32>
    %93 = arith.mulf %84, %36 : vector<8x128xf32>
    %94 = arith.addf %92, %93 : vector<8x128xf32>
    %95 = tpu.concatenate %94, %66 in 1 : vector<8x128xf32>, vector<8x128xf32> -> vector<8x256xf32>
    %c0_42 = arith.constant 0 : index
    %c0_43 = arith.constant 0 : index
    %96 = vector.load %arg15[%c0_42, %c0_43] : memref<256x128xf32, #tpu.memory_space<vmem>>, vector<256x128xf32>
    %cst_44 = arith.constant dense<0.000000e+00> : vector<8x128xf32>
    %97 = tpu.matmul %95, %96, %cst_44 {dimension_numbers = #tpu.dot_dimension_numbers<[1], [0], [0], [1], [0, 0, 1, 1], [], []>} : vector<8x256xf32>, vector<256x128xf32>, vector<8x128xf32> -> vector<8x128xf32>
    %98 = arith.addf %8, %97 : vector<8x128xf32>
    %c0_45 = arith.constant 0 : index
    %c0_46 = arith.constant 0 : index
    %99 = vector.load %arg16[%c0_45, %c0_46] : memref<1x128xf32, #tpu.memory_space<vmem>>, vector<1x128xf32>
    %100 = vector.broadcast %99 : vector<1x128xf32> to vector<8x128xf32>
    %101 = arith.addf %98, %100 : vector<8x128xf32>
    %102 = math.tanh %101 : vector<8x128xf32>
    %c0_47 = arith.constant 0 : index
    %c0_48 = arith.constant 0 : index
    %c0_49 = arith.constant 0 : index
    %103 = vector.load %arg17[%c0_47, %c0_48, %c0_49] : memref<1x8x128xf32, #tpu.memory_space<vmem>>, vector<1x8x128xf32>
    %104 = vector.shape_cast %103 : vector<1x8x128xf32> to vector<8x128xf32>
    %105 = vector.shape_cast %102 : vector<8x128xf32> to vector<1x8x128xf32>
    tpu.vector_store %arg17[%c0_47, %c0_48, %c0_49], %105 {strides = array<i32>} : memref<1x8x128xf32, #tpu.memory_space<vmem>>, vector<1x8x128xf32>,
    %c0_50 = arith.constant 0 : index
    %c0_51 = arith.constant 0 : index
    %106 = vector.load %arg18[%c0_50, %c0_51] : memref<8x128xf32, #tpu.memory_space<vmem>>, vector<8x128xf32>
    tpu.vector_store %arg18[%c0_50, %c0_51], %94 {strides = array<i32>} : memref<8x128xf32, #tpu.memory_space<vmem>>, vector<8x128xf32>,
    return
  }
  func.func @transform_0(%arg0: i32) -> (i32, i32, i32) {
    %c0_i32 = arith.constant 0 : i32
    %c0_i32_0 = arith.constant 0 : i32
    %c0_i32_1 = arith.constant 0 : i32
    return %arg0, %c0_i32, %c0_i32_0 : i32, i32, i32
  }
  func.func @transform_1(%arg0: i32) -> (i32, i32) {
    %c0_i32 = arith.constant 0 : i32
    %c0_i32_0 = arith.constant 0 : i32
    %c0_i32_1 = arith.constant 0 : i32
    return %c0_i32, %c0_i32_0 : i32, i32
  }
  func.func @transform_2(%arg0: i32) -> (i32, i32) {
    %c0_i32 = arith.constant 0 : i32
    %c0_i32_0 = arith.constant 0 : i32
    %c0_i32_1 = arith.constant 0 : i32
    return %c0_i32, %c0_i32_0 : i32, i32
  }
  func.func @transform_3(%arg0: i32) -> (i32, i32, i32) {
    %c0_i32 = arith.constant 0 : i32
    %c0_i32_0 = arith.constant 0 : i32
    %c0_i32_1 = arith.constant 0 : i32
    %c0_i32_2 = arith.constant 0 : i32
    return %c0_i32, %c0_i32_0, %c0_i32_1 : i32, i32, i32
  }
  func.func @transform_4(%arg0: i32) -> (i32, i32) {
    %c0_i32 = arith.constant 0 : i32
    %c0_i32_0 = arith.constant 0 : i32
    %c0_i32_1 = arith.constant 0 : i32
    return %c0_i32, %c0_i32_0 : i32, i32
  }
  func.func @transform_5(%arg0: i32) -> (i32, i32) {
    %c0_i32 = arith.constant 0 : i32
    %c0_i32_0 = arith.constant 0 : i32
    %c0_i32_1 = arith.constant 0 : i32
    return %c0_i32, %c0_i32_0 : i32, i32
  }
  func.func @transform_6(%arg0: i32) -> (i32, i32) {
    %c0_i32 = arith.constant 0 : i32
    %c0_i32_0 = arith.constant 0 : i32
    %c0_i32_1 = arith.constant 0 : i32
    return %c0_i32, %c0_i32_0 : i32, i32
  }
  func.func @transform_7(%arg0: i32) -> (i32, i32) {
    %c0_i32 = arith.constant 0 : i32
    %c0_i32_0 = arith.constant 0 : i32
    %c0_i32_1 = arith.constant 0 : i32
    return %c0_i32, %c0_i32_0 : i32, i32
  }
  func.func @transform_8(%arg0: i32) -> (i32, i32) {
    %c0_i32 = arith.constant 0 : i32
    %c0_i32_0 = arith.constant 0 : i32
    %c0_i32_1 = arith.constant 0 : i32
    return %c0_i32, %c0_i32_0 : i32, i32
  }
  func.func @transform_9(%arg0: i32) -> (i32, i32) {
    %c0_i32 = arith.constant 0 : i32
    %c0_i32_0 = arith.constant 0 : i32
    %c0_i32_1 = arith.constant 0 : i32
    return %c0_i32, %c0_i32_0 : i32, i32
  }
  func.func @transform_10(%arg0: i32) -> (i32, i32) {
    %c0_i32 = arith.constant 0 : i32
    %c0_i32_0 = arith.constant 0 : i32
    %c0_i32_1 = arith.constant 0 : i32
    return %c0_i32, %c0_i32_0 : i32, i32
  }
  func.func @transform_11(%arg0: i32) -> (i32, i32) {
    %c0_i32 = arith.constant 0 : i32
    %c0_i32_0 = arith.constant 0 : i32
    %c0_i32_1 = arith.constant 0 : i32
    return %c0_i32, %c0_i32_0 : i32, i32
  }
  func.func @transform_12(%arg0: i32) -> (i32, i32) {
    %c0_i32 = arith.constant 0 : i32
    %c0_i32_0 = arith.constant 0 : i32
    %c0_i32_1 = arith.constant 0 : i32
    return %c0_i32, %c0_i32_0 : i32, i32
  }
  func.func @transform_13(%arg0: i32) -> (i32, i32) {
    %c0_i32 = arith.constant 0 : i32
    %c0_i32_0 = arith.constant 0 : i32
    %c0_i32_1 = arith.constant 0 : i32
    return %c0_i32, %c0_i32_0 : i32, i32
  }
  func.func @transform_14(%arg0: i32) -> (i32, i32) {
    %c0_i32 = arith.constant 0 : i32
    %c0_i32_0 = arith.constant 0 : i32
    %c0_i32_1 = arith.constant 0 : i32
    return %c0_i32, %c0_i32_0 : i32, i32
  }
  func.func @transform_15(%arg0: i32) -> (i32, i32) {
    %c0_i32 = arith.constant 0 : i32
    %c0_i32_0 = arith.constant 0 : i32
    %c0_i32_1 = arith.constant 0 : i32
    return %c0_i32, %c0_i32_0 : i32, i32
  }
  func.func @transform_16(%arg0: i32) -> (i32, i32, i32) {
    %c0_i32 = arith.constant 0 : i32
    %c0_i32_0 = arith.constant 0 : i32
    %c0_i32_1 = arith.constant 0 : i32
    return %arg0, %c0_i32, %c0_i32_0 : i32, i32, i32
  }
  func.func @transform_17(%arg0: i32) -> (i32, i32) {
    %c0_i32 = arith.constant 0 : i32
    %c0_i32_0 = arith.constant 0 : i32
    %c0_i32_1 = arith.constant 0 : i32
    return %c0_i32, %c0_i32_0 : i32, i32
  }
}

</mosaic_0001>

<bundles_post_ra>
// kernel: vallina_decoder_pallas.1
= control target key start
LH: loop header
LB: loop body
LE: loop exit
PB: predicated region body
PF: predicated region fallthrough
CT: control target
= control target key end

     0   :  { %vm2413_vm0 = vmmov 0   ;;  %vm920_vm1 = vcmask 1041409   ;;  %vm922_vm2 = vcmask 1042434   ;;  %vm924_vm3 = vcmask 1043459   ;;  %s3815_s8 = inlined_call_operand.vmem [shape: f32[128,128], index: 8, kind: input, shape index: {}]   ;;  %s3816_s4 = inlined_call_operand.vmem [shape: f32[256,512], index: 4, kind: input, shape index: {}]   ;;  %s3817_s3 = inlined_call_operand.vmem [shape: f32[8,8,128], index: 3, kind: input, shape index: {}]   ;;  %s3818_s1 = inlined_call_operand.vmem [shape: f32[8,128], index: 1, kind: input, shape index: {}]   ;;  %s3819_s0 = inlined_call_operand.vmem [shape: f32[1,8,128], index: 0, kind: input, shape index: {}]   ;;  %s3820_s10 = inlined_call_operand.vmem [shape: f32[128,128], index: 10, kind: input, shape index: {}]   ;;  %s3821_s2 = inlined_call_operand.vmem [shape: f32[8,8], index: 2, kind: input, shape index: {}]   ;;  %s3822_s5 = inlined_call_operand.vmem [shape: f32[1,512], index: 5, kind: input, shape index: {}]   ;;  %s3823_s11 = inlined_call_operand.vmem [shape: f32[1,128], index: 11, kind: input, shape index: {}]   ;;  %s3824_s9 = inlined_call_operand.vmem [shape: f32[1,128], index: 9, kind: input, shape index: {}]   ;;  %s3825_s12 = inlined_call_operand.vmem [shape: f32[1,128], index: 12, kind: input, shape index: {}]   ;;  %s3826_s6 = inlined_call_operand.vmem [shape: f32[256,512], index: 6, kind: input, shape index: {}]   ;;  %s3827_s14 = inlined_call_operand.vmem [shape: f32[256,128], index: 14, kind: input, shape index: {}]   ;;  %s3828_s13 = inlined_call_operand.vmem [shape: f32[128,128], index: 13, kind: input, shape index: {}]   ;;  %s3829_s7 = inlined_call_operand.vmem [shape: f32[1,512], index: 7, kind: input, shape index: {}]   ;;  %s3830_s17 = inlined_call_operand.vmem [shape: f32[8,128], index: 17, kind: output, shape index: {1}]   ;;  %s3831_s15 = inlined_call_operand.vmem [shape: f32[1,128], index: 15, kind: input, shape index: {}]   ;;  %s3832_s16 = inlined_call_operand.vmem [shape: f32[1,8,128], index: 16, kind: output, shape index: {0}]  }
   0x1   :  { %3835 = sst [smem:[#allocation3_spill]] %s3815_s8  ;;  %v61_v46 = vld [vmem:[%s3817_s3] sm:$0xff]  ;;  %vm926_vm4 = vcmask 1044484   ;;  %vm928_vm5 = vcmask 1045509   ;;  %vm930_vm6 = vcmask 1046534   ;;  %vm932_vm7 = vcmask 1047559  }
   0x2   :  { %3836 = sst [smem:[#allocation4_spill]] %s3816_s4  ;;  %s3837_s26 = sld [smem:[#allocation3_spill]]  ;;  %1883 = vmatprep.mubr.f32.mxu0 %v61_v46  ;;  %vm935_vm8 = vcmask 64512  }
   0x3   :  { %s3838_s20 = sld [smem:[#allocation4_spill]] }
   0x8   :  { %v69_v0 = vld [vmem:[%s3837_s26] sm:$0xff]  ;;  %v70_v1 = vld [vmem:[%s3837_s26 + $0x8] sm:$0xff]  ;;  %v71_v2 = vld [vmem:[%s3837_s26 + $0x10] sm:$0xff] }
   0x9   :  { %v1965_v3 = vpack.c.bf16 %v70_v1, %v69_v0  ;;  %v72_v4 = vld [vmem:[%s3837_s26 + $0x18] sm:$0xff]  ;;  %v232_v5 = vld [vmem:[%s3838_s20 + $0x8] sm:$0xff]  ;;  %v231_v9 = vld [vmem:[%s3838_s20] sm:$0xff] }
   0xa   :  { %v236_v6 = vld [vmem:[%s3838_s20 + $0x28] sm:$0xff]  ;;  %v1969_v7 = vpack.c.bf16 %v72_v4, %v71_v2  ;;  %v235_v10 = vld [vmem:[%s3838_s20 + $0x20] sm:$0xff]  ;;  %v75_v21 = vld [vmem:[%s3837_s26 + $0x30] sm:$0xff] }
   0xb   :  { %v1997_v8 = vpack.c.bf16 %v236_v6, %v232_v5  ;;  %v73_v11 = vld [vmem:[%s3837_s26 + $0x20] sm:$0xff]  ;;  %1966 = vmatprep.subr.bf16.mxu0 %v1965_v3  ;;  %v1999_v12 = vpack.c.bf16 %v235_v10, %v231_v9  ;;  %v74_v13 = vld [vmem:[%s3837_s26 + $0x28] sm:$0xff]  ;;  %v76_v24 = vld [vmem:[%s3837_s26 + $0x38] sm:$0xff] }
   0xc   :  { %v240_v14 = vld [vmem:[%s3838_s20 + $0x48] sm:$0xff]  ;;  %1968 = vmatpush3.bf16.msra.mxu0 %v1965_v3  ;;  %v239_v17 = vld [vmem:[%s3838_s20 + $0x40] sm:$0xff]  ;;  %v1973_v19 = vpack.c.bf16 %v74_v13, %v73_v11  ;;  %v1977_v30 = vpack.c.bf16 %v76_v24, %v75_v21  ;;  %v79_v41 = vld [vmem:[%s3837_s26 + $0x50] sm:$0xff] }
   0xd   :  { %v244_v15 = vld [vmem:[%s3838_s20 + $0x68] sm:$0xff]  ;;  %1998 = vmatprep.subr.bf16.mxu1 %v1997_v8  ;;  %v243_v18 = vld [vmem:[%s3838_s20 + $0x60] sm:$0xff]  ;;  %1970 = vmatprep.subr.bf16.mxu0 %v1969_v7  ;;  %v80_v42 = vld [vmem:[%s3837_s26 + $0x58] sm:$0xff] }
   0xe   :  { %v2001_v16 = vpack.c.bf16 %v244_v15, %v240_v14  ;;  %2000 = vmatpush1.bf16.msra.mxu1 %v1999_v12  ;;  %v2003_v20 = vpack.c.bf16 %v243_v18, %v239_v17  ;;  %v248_v22 = vld [vmem:[%s3838_s20 + $0x88] sm:$0xff]  ;;  %v247_v26 = vld [vmem:[%s3838_s20 + $0x80] sm:$0xff]  ;;  %v1985_v49 = vpack.c.bf16 %v80_v42, %v79_v41  ;;  %v83_v60 = vld [vmem:[%s3837_s26 + $0x70] sm:$0xff] }
   0xf   :  { %v252_v23 = vld [vmem:[%s3838_s20 + $0xa8] sm:$0xff]  ;;  %v251_v27 = vld [vmem:[%s3838_s20 + $0xa0] sm:$0xff]  ;;  %v84_v61 = vld [vmem:[%s3837_s26 + $0x78] sm:$0xff] }
  0x10   :  { %2002 = vmatprep.subr.bf16.mxu1 %v2001_v16  ;;  %v2005_v25 = vpack.c.bf16 %v252_v23, %v248_v22  ;;  %v256_v28 = vld [vmem:[%s3838_s20 + $0xc8] sm:$0xff]  ;;  %1972 = vmatpush3.bf16.msra.mxu0 %v1969_v7  ;;  %v2007_v31 = vpack.c.bf16 %v251_v27, %v247_v26  ;;  %v77_v32 = vld [vmem:[%s3837_s26 + $0x40] sm:$0xff]  ;;  %v1993_v3 = vpack.c.bf16 %v84_v61, %v83_v60  ;;  %v234_v5 = vld [vmem:[%s3838_s20 + $0x18] sm:$0xff] }
  0x11   :  { %v260_v29 = vld [vmem:[%s3838_s20 + $0xe8] sm:$0xff]  ;;  %1974 = vmatprep.subr.bf16.mxu0 %v1973_v19  ;;  %v255_v35 = vld [vmem:[%s3838_s20 + $0xc0] sm:$0xff]  ;;  %v238_v6 = vld [vmem:[%s3838_s20 + $0x38] sm:$0xff] }
  0x12   :  { %2004 = vmatpush1.bf16.msra.mxu1 %v2003_v20  ;;  %v78_v33 = vld [vmem:[%s3837_s26 + $0x48] sm:$0xff]  ;;  %v2009_v34 = vpack.c.bf16 %v260_v29, %v256_v28  ;;  %v259_v36 = vld [vmem:[%s3838_s20 + $0xe0] sm:$0xff]  ;;  %v2061_v12 = vpack.c.bf16 %v238_v6, %v234_v5  ;;  %v233_v13 = vld [vmem:[%s3838_s20 + $0x10] sm:$0xff] }
  0x13   :  { %2006 = vmatprep.subr.bf16.mxu1 %v2005_v25  ;;  %v264_v37 = vld [vmem:[%s3838_s20 + $0x108] sm:$0xff]  ;;  %v1981_v39 = vpack.c.bf16 %v78_v33, %v77_v32  ;;  %v2011_v40 = vpack.c.bf16 %v259_v36, %v255_v35  ;;  %v263_v44 = vld [vmem:[%s3838_s20 + $0x100] sm:$0xff]  ;;  %v237_v14 = vld [vmem:[%s3838_s20 + $0x30] sm:$0xff] }
  0x14   :  { %v268_v38 = vld [vmem:[%s3838_s20 + $0x128] sm:$0xff]  ;;  %1976 = vmatpush3.bf16.msra.mxu0 %v1973_v19  ;;  %v267_v45 = vld [vmem:[%s3838_s20 + $0x120] sm:$0xff]  ;;  %v242_v16 = vld [vmem:[%s3838_s20 + $0x58] sm:$0xff]  ;;  %v2063_v24 = vpack.c.bf16 %v237_v14, %v233_v13 }
  0x15   :  { %1978 = vmatprep.subr.bf16.mxu0 %v1977_v30  ;;  %v2013_v43 = vpack.c.bf16 %v268_v38, %v264_v37  ;;  %v272_v47 = vld [vmem:[%s3838_s20 + $0x148] sm:$0xff]  ;;  %v2015_v50 = vpack.c.bf16 %v267_v45, %v263_v44  ;;  %v81_v51 = vld [vmem:[%s3837_s26 + $0x60] sm:$0xff]  ;;  %v246_v17 = vld [vmem:[%s3838_s20 + $0x78] sm:$0xff] }
  0x16   :  { %2008 = vmatpush1.bf16.msra.mxu1 %v2007_v31  ;;  %v276_v48 = vld [vmem:[%s3838_s20 + $0x168] sm:$0xff]  ;;  %v271_v54 = vld [vmem:[%s3838_s20 + $0x140] sm:$0xff]  ;;  %v2065_v25 = vpack.c.bf16 %v246_v17, %v242_v16  ;;  %v241_v26 = vld [vmem:[%s3838_s20 + $0x50] sm:$0xff] }
  0x17   :  { %2010 = vmatprep.subr.bf16.mxu1 %v2009_v34  ;;  %v82_v52 = vld [vmem:[%s3837_s26 + $0x68] sm:$0xff]  ;;  %v2017_v53 = vpack.c.bf16 %v276_v48, %v272_v47  ;;  %v275_v55 = vld [vmem:[%s3838_s20 + $0x160] sm:$0xff]  ;;  %v245_v27 = vld [vmem:[%s3838_s20 + $0x70] sm:$0xff] }
  0x18   :  { %1980 = vmatpush3.bf16.msra.mxu0 %v1977_v30  ;;  %v280_v56 = vld [vmem:[%s3838_s20 + $0x188] sm:$0xff]  ;;  %v1989_v58 = vpack.c.bf16 %v82_v52, %v81_v51  ;;  %v2019_v59 = vpack.c.bf16 %v275_v55, %v271_v54  ;;  %v279_v63 = vld [vmem:[%s3838_s20 + $0x180] sm:$0xff]  ;;  %v250_v29 = vld [vmem:[%s3838_s20 + $0x98] sm:$0xff]  ;;  %v2067_v36 = vpack.c.bf16 %v245_v27, %v241_v26 }
  0x19   :  { %1982 = vmatprep.subr.bf16.mxu0 %v1981_v39  ;;  %v284_v57 = vld [vmem:[%s3838_s20 + $0x1a8] sm:$0xff]  ;;  %v283_v0 = vld [vmem:[%s3838_s20 + $0x1a0] sm:$0xff]  ;;  %v254_v30 = vld [vmem:[%s3838_s20 + $0xb8] sm:$0xff] }
  0x1a   :  { %2012 = vmatpush1.bf16.msra.mxu1 %v2011_v40  ;;  %v2021_v62 = vpack.c.bf16 %v284_v57, %v280_v56  ;;  %v288_v1 = vld [vmem:[%s3838_s20 + $0x1c8] sm:$0xff]  ;;  %v2023_v4 = vpack.c.bf16 %v283_v0, %v279_v63  ;;  %v287_v8 = vld [vmem:[%s3838_s20 + $0x1c0] sm:$0xff]  ;;  %v2069_v37 = vpack.c.bf16 %v254_v30, %v250_v29  ;;  %v249_v38 = vld [vmem:[%s3838_s20 + $0x90] sm:$0xff] }
  0x1b   :  { %2014 = vmatprep.subr.bf16.mxu1 %v2013_v43  ;;  %v292_v2 = vld [vmem:[%s3838_s20 + $0x1e8] sm:$0xff]  ;;  %v291_v9 = vld [vmem:[%s3838_s20 + $0x1e0] sm:$0xff]  ;;  %v258_v41 = vld [vmem:[%s3838_s20 + $0xd8] sm:$0xff] }
  0x1c   :  { %1984 = vmatpush3.bf16.msra.mxu0 %v1981_v39  ;;  %v2025_v7 = vpack.c.bf16 %v292_v2, %v288_v1  ;;  %v296_v10 = vld [vmem:[%s3838_s20 + $0x208] sm:$0xff]  ;;  %v2027_v15 = vpack.c.bf16 %v291_v9, %v287_v8  ;;  %v295_v19 = vld [vmem:[%s3838_s20 + $0x200] sm:$0xff]  ;;  %v253_v39 = vld [vmem:[%s3838_s20 + $0xb0] sm:$0xff] }
  0x1d   :  { %1986 = vmatprep.subr.bf16.mxu0 %v1985_v49  ;;  %v300_v11 = vld [vmem:[%s3838_s20 + $0x228] sm:$0xff]  ;;  %v299_v20 = vld [vmem:[%s3838_s20 + $0x220] sm:$0xff]  ;;  %v262_v42 = vld [vmem:[%s3838_s20 + $0xf8] sm:$0xff]  ;;  %v2071_v48 = vpack.c.bf16 %v253_v39, %v249_v38 }
  0x1e   :  { %2016 = vmatpush1.bf16.msra.mxu1 %v2015_v50  ;;  %v2029_v18 = vpack.c.bf16 %v300_v11, %v296_v10  ;;  %v304_v21 = vld [vmem:[%s3838_s20 + $0x248] sm:$0xff]  ;;  %v2031_v28 = vpack.c.bf16 %v299_v20, %v295_v19  ;;  %v303_v32 = vld [vmem:[%s3838_s20 + $0x240] sm:$0xff]  ;;  %v2073_v50 = vpack.c.bf16 %v262_v42, %v258_v41  ;;  %v257_v51 = vld [vmem:[%s3838_s20 + $0xd0] sm:$0xff] }
  0x1f   :  { %2018 = vmatprep.subr.bf16.mxu1 %v2017_v53  ;;  %v308_v22 = vld [vmem:[%s3838_s20 + $0x268] sm:$0xff]  ;;  %v307_v33 = vld [vmem:[%s3838_s20 + $0x260] sm:$0xff]  ;;  %v261_v52 = vld [vmem:[%s3838_s20 + $0xf0] sm:$0xff] }
  0x20   :  { %1988 = vmatpush3.bf16.msra.mxu0 %v1985_v49  ;;  %v62_v23 = vld [vmem:[%s3817_s3 + $0x8] sm:$0xff]  ;;  %v2033_v31 = vpack.c.bf16 %v308_v22, %v304_v21  ;;  %v2035_v40 = vpack.c.bf16 %v307_v33, %v303_v32  ;;  %v311_v44 = vld [vmem:[%s3838_s20 + $0x280] sm:$0xff]  ;;  %v266_v54 = vld [vmem:[%s3838_s20 + $0x118] sm:$0xff]  ;;  %v2075_v61 = vpack.c.bf16 %v261_v52, %v257_v51 }
  0x21   :  { %1990 = vmatprep.subr.bf16.mxu0 %v1989_v58  ;;  %v312_v34 = vld [vmem:[%s3838_s20 + $0x288] sm:$0xff]  ;;  %v315_v45 = vld [vmem:[%s3838_s20 + $0x2a0] sm:$0xff]  ;;  %v270_v55 = vld [vmem:[%s3838_s20 + $0x138] sm:$0xff] }
  0x22   :  { %2020 = vmatpush1.bf16.msra.mxu1 %v2019_v59  ;;  %v316_v35 = vld [vmem:[%s3838_s20 + $0x2a8] sm:$0xff]  ;;  %v2744_v49 = vld [vmem:[%s3818_s1] sm:$0xff]  ;;  %v2039_v53 = vpack.c.bf16 %v315_v45, %v311_v44  ;;  %v269_v63 = vld [vmem:[%s3838_s20 + $0x130] sm:$0xff]  ;;  %v2077_v0 = vpack.c.bf16 %v270_v55, %v266_v54 }
  0x23   :  { %2022 = vmatprep.subr.bf16.mxu1 %v2021_v62  ;;  %v2037_v43 = vpack.c.bf16 %v316_v35, %v312_v34  ;;  %v320_v46 = vld [vmem:[%s3838_s20 + $0x2c8] sm:$0xff]  ;;  %v319_v57 = vld [vmem:[%s3838_s20 + $0x2c0] sm:$0xff]  ;;  %445 = vmatprep.mubr.f32.mxu1 %v2744_v49  ;;  %v265_v62 = vld [vmem:[%s3838_s20 + $0x110] sm:$0xff] }
  0x24   :  { %1992 = vmatpush3.bf16.msra.mxu0 %v1989_v58  ;;  %v324_v47 = vld [vmem:[%s3838_s20 + $0x2e8] sm:$0xff]  ;;  %v323_v58 = vld [vmem:[%s3838_s20 + $0x2e0] sm:$0xff]  ;;  %v274_v2 = vld [vmem:[%s3838_s20 + $0x158] sm:$0xff] }
  0x25   :  { %1994 = vmatprep.subr.bf16.mxu0 %v1993_v3  ;;  %v2041_v56 = vpack.c.bf16 %v324_v47, %v320_v46  ;;  %v328_v59 = vld [vmem:[%s3838_s20 + $0x308] sm:$0xff]  ;;  %v2043_v1 = vpack.c.bf16 %v323_v58, %v319_v57  ;;  %v278_v5 = vld [vmem:[%s3838_s20 + $0x178] sm:$0xff]  ;;  %v331_v8 = vld [vmem:[%s3838_s20 + $0x320] sm:$0xff] }
  0x26   :  { %2024 = vmatpush1.bf16.msra.mxu1 %v2023_v4  ;;  %v332_v60 = vld [vmem:[%s3838_s20 + $0x328] sm:$0xff]  ;;  %v64_v4 = vld [vmem:[%s3817_s3 + $0x18] sm:$0xff]  ;;  %v65_v11 = vld [vmem:[%s3817_s3 + $0x20] sm:$0xff] }
  0x27   :  { %2026 = vmatprep.subr.bf16.mxu1 %v2025_v7  ;;  %v2045_v6 = vpack.c.bf16 %v332_v60, %v328_v59  ;;  %v327_v7 = vld [vmem:[%s3838_s20 + $0x300] sm:$0xff]  ;;  %v336_v9 = vld [vmem:[%s3838_s20 + $0x348] sm:$0xff]  ;;  %v273_v13 = vld [vmem:[%s3838_s20 + $0x150] sm:$0xff] }
  0x28   :  { %1996 = vmatpush3.bf16.msra.mxu0 %v1993_v3  ;;  %v63_v3 = vld [vmem:[%s3817_s3 + $0x10] sm:$0xff]  ;;  %v340_v10 = vld [vmem:[%s3838_s20 + $0x368] sm:$0xff]  ;;  %v2047_v17 = vpack.c.bf16 %v331_v8, %v327_v7  ;;  %v286_v20 = vld [vmem:[%s3838_s20 + $0x1b8] sm:$0xff] }
  0x29   :  { %2062 = vmatprep.subr.bf16.mxu0 %v2061_v12  ;;  %v2079_v12 = vpack.c.bf16 %v269_v63, %v265_v62  ;;  %v66_v14 = vld [vmem:[%s3817_s3 + $0x28] sm:$0xff]  ;;  %v277_v16 = vld [vmem:[%s3838_s20 + $0x170] sm:$0xff]  ;;  %v2049_v21 = vpack.c.bf16 %v340_v10, %v336_v9  ;;  %v335_v22 = vld [vmem:[%s3838_s20 + $0x340] sm:$0xff] }
  0x2a   :  { %2028 = vmatpush1.bf16.msra.mxu1 %v2027_v15  ;;  %v2081_v15 = vpack.c.bf16 %v278_v5, %v274_v2  ;;  %v67_v19 = vld [vmem:[%s3817_s3 + $0x30] sm:$0xff]  ;;  %v2083_v26 = vpack.c.bf16 %v277_v16, %v273_v13  ;;  %v68_v27 = vld [vmem:[%s3817_s3 + $0x38] sm:$0xff]  ;;  %v343_v35 = vld [vmem:[%s3838_s20 + $0x380] sm:$0xff] }
  0x2b   :  { %2030 = vmatprep.subr.bf16.mxu1 %v2029_v18  ;;  %1884 = vmatmul.mubr.f32.vlgmr.msra.gmra.mrb[0].mxu0 %v62_v23  ;;  %v282_v18 = vld [vmem:[%s3838_s20 + $0x198] sm:$0xff]  ;;  %v339_v23 = vld [vmem:[%s3838_s20 + $0x360] sm:$0xff]  ;;  %v281_v29 = vld [vmem:[%s3838_s20 + $0x190] sm:$0xff] }
  0x2c   :  { %2064 = vmatpush1.bf16.msra.mxu0 %v2063_v24  ;;  %1886 = vmatprep.mubr.f32.mxu0 %v63_v3  ;;  %v344_v24 = vld [vmem:[%s3838_s20 + $0x388] sm:$0xff]  ;;  %v285_v30 = vld [vmem:[%s3838_s20 + $0x1b0] sm:$0xff]  ;;  %v290_v32 = vld [vmem:[%s3838_s20 + $0x1d8] sm:$0xff] }
  0x2d   :  { %2066 = vmatprep.subr.bf16.mxu0 %v2065_v25  ;;  %v348_v25 = vld [vmem:[%s3838_s20 + $0x3a8] sm:$0xff]  ;;  %v294_v33 = vld [vmem:[%s3838_s20 + $0x1f8] sm:$0xff]  ;;  %v2087_v39 = vpack.c.bf16 %v285_v30, %v281_v29  ;;  %v289_v41 = vld [vmem:[%s3838_s20 + $0x1d0] sm:$0xff] }
  0x2e   :  { %2032 = vmatpush1.bf16.msra.mxu1 %v2031_v28  ;;  %v2085_v28 = vpack.c.bf16 %v286_v20, %v282_v18  ;;  %v2053_v34 = vpack.c.bf16 %v348_v25, %v344_v24  ;;  %v356_v38 = vld [vmem:[%s3838_s20 + $0x3e8] sm:$0xff]  ;;  %v293_v42 = vld [vmem:[%s3838_s20 + $0x1f0] sm:$0xff]  ;;  %v298_v44 = vld [vmem:[%s3838_s20 + $0x218] sm:$0xff] }
  0x2f   :  { %2034 = vmatprep.subr.bf16.mxu1 %v2033_v31  ;;  %1887 = vmatmul.mubr.f32.gmra.mrb[2].mxu0 %v64_v4  ;;  %v2051_v31 = vpack.c.bf16 %v339_v23, %v335_v22  ;;  %v302_v45 = vld [vmem:[%s3838_s20 + $0x238] sm:$0xff]  ;;  %v351_v47 = vld [vmem:[%s3838_s20 + $0x3c0] sm:$0xff]  ;;  %v297_v52 = vld [vmem:[%s3838_s20 + $0x210] sm:$0xff] }
  0x30   :  { %2068 = vmatpush1.bf16.msra.mxu0 %v2067_v36  ;;  %1889 = vmatprep.mubr.f32.mxu0 %v65_v11  ;;  %v347_v36 = vld [vmem:[%s3838_s20 + $0x3a0] sm:$0xff]  ;;  %v2093_v51 = vpack.c.bf16 %v302_v45, %v298_v44  ;;  %v306_v55 = vld [vmem:[%s3838_s20 + $0x258] sm:$0xff]  ;;  %v305_v59 = vld [vmem:[%s3838_s20 + $0x250] sm:$0xff] }
  0x31   :  { %2070 = vmatprep.subr.bf16.mxu0 %v2069_v37  ;;  %v352_v37 = vld [vmem:[%s3838_s20 + $0x3c8] sm:$0xff]  ;;  %v309_v60 = vld [vmem:[%s3838_s20 + $0x270] sm:$0xff]  ;;  %v314_v62 = vld [vmem:[%s3838_s20 + $0x298] sm:$0xff] }
  0x32   :  { %2036 = vmatpush1.bf16.msra.mxu1 %v2035_v40  ;;  %v2089_v40 = vpack.c.bf16 %v294_v33, %v290_v32  ;;  %v2057_v46 = vpack.c.bf16 %v356_v38, %v352_v37  ;;  %v318_v63 = vld [vmem:[%s3838_s20 + $0x2b8] sm:$0xff]  ;;  %v313_v2 = vld [vmem:[%s3838_s20 + $0x290] sm:$0xff]  ;;  %v543_v37 = vld [vmem:[%s3820_s10 + $0x8] sm:$0xff] }
  0x33   :  { %2038 = vmatprep.subr.bf16.mxu1 %v2037_v43  ;;  %1890 = vmatmul.mubr.f32.gmra.mrb[4].mxu0 %v66_v14  ;;  %v2055_v43 = vpack.c.bf16 %v347_v36, %v343_v35  ;;  %v317_v3 = vld [vmem:[%s3838_s20 + $0x2b0] sm:$0xff]  ;;  %v322_v4 = vld [vmem:[%s3838_s20 + $0x2d8] sm:$0xff]  ;;  %v2412_v35 = vmov 0.0|0.0   ;;  %v542_v36 = vld [vmem:[%s3820_s10] sm:$0xff] }
  0x34   :  { %2072 = vmatpush1.bf16.msra.mxu0 %v2071_v48  ;;  %1892 = vmatprep.mubr.f32.mxu0 %v67_v19  ;;  %v355_v48 = vld [vmem:[%s3838_s20 + $0x3e0] sm:$0xff]  ;;  %v326_v5 = vld [vmem:[%s3838_s20 + $0x2f8] sm:$0xff]  ;;  %v321_v8 = vld [vmem:[%s3838_s20 + $0x2d0] sm:$0xff] }
  0x35   :  { %2074 = vmatprep.subr.bf16.mxu0 %v2073_v50  ;;  %v2091_v50 = vpack.c.bf16 %v293_v42, %v289_v41  ;;  %v2059_v54 = vpack.c.bf16 %v355_v48, %v351_v47  ;;  %v2105_v7 = vpack.c.bf16 %v326_v5, %v322_v4  ;;  %v325_v9 = vld [vmem:[%s3838_s20 + $0x2f0] sm:$0xff]  ;;  %v330_v10 = vld [vmem:[%s3838_s20 + $0x318] sm:$0xff]  ;;  %v546_v42 = vld [vmem:[%s3820_s10 + $0x20] sm:$0xff] }
  0x36   :  { %2040 = vmatpush1.bf16.msra.mxu1 %v2039_v53  ;;  %v301_v53 = vld [vmem:[%s3838_s20 + $0x230] sm:$0xff]  ;;  %v334_v11 = vld [vmem:[%s3838_s20 + $0x338] sm:$0xff]  ;;  %v550_v48 = vld [vmem:[%s3820_s10 + $0x40] sm:$0xff] }
  0x37   :  { %2042 = vmatprep.subr.bf16.mxu1 %v2041_v56  ;;  %1893 = vmatmul.mubr.f32.gmra.mrb[6].mxu0 %v68_v27  ;;  %v310_v56 = vld [vmem:[%s3838_s20 + $0x278] sm:$0xff]  ;;  %v2095_v57 = vpack.c.bf16 %v301_v53, %v297_v52  ;;  %v2109_v13 = vpack.c.bf16 %v334_v11, %v330_v10  ;;  %v329_v14 = vld [vmem:[%s3838_s20 + $0x310] sm:$0xff] }
  0x38   :  { %2076 = vmatpush1.bf16.msra.mxu0 %v2075_v61  ;;  %516 = vmatprep.mubr.f32.mxu0 %v2744_v49  ;;  %v2097_v58 = vpack.c.bf16 %v310_v56, %v306_v55  ;;  %v205_v61 = vld [vmem:[%s3819_s0] sm:$0xff]  ;;  %v338_v16 = vld [vmem:[%s3838_s20 + $0x358] sm:$0xff]  ;;  %v337_v20 = vld [vmem:[%s3838_s20 + $0x350] sm:$0xff] }
  0x39   :  { %2078 = vmatprep.subr.bf16.mxu0 %v2077_v0  ;;  %v2099_v0 = vpack.c.bf16 %v309_v60, %v305_v59  ;;  %v346_v22 = vld [vmem:[%s3838_s20 + $0x398] sm:$0xff]  ;;  %v349_v27 = vld [vmem:[%s3838_s20 + $0x3b0] sm:$0xff]  ;;  %v554_v55 = vld [vmem:[%s3820_s10 + $0x60] sm:$0xff] }
  0x3a   :  { %2044 = vmatpush1.bf16.msra.mxu1 %v2043_v1  ;;  %v2101_v1 = vpack.c.bf16 %v318_v63, %v314_v62  ;;  %v350_v23 = vld [vmem:[%s3838_s20 + $0x3b8] sm:$0xff]  ;;  %v353_v32 = vld [vmem:[%s3838_s20 + $0x3d0] sm:$0xff]  ;;  %v555_v56 = vld [vmem:[%s3820_s10 + $0x68] sm:$0xff] }
  0x3b   :  { %2046 = vmatprep.subr.bf16.mxu1 %v2045_v6  ;;  %v2103_v6 = vpack.c.bf16 %v317_v3, %v313_v2  ;;  %v2117_v25 = vpack.c.bf16 %v350_v23, %v346_v22  ;;  %v358_v29 = vld [vmem:[%s3838_s20 + $0x3f8] sm:$0xff]  ;;  %v357_v33 = vld [vmem:[%s3838_s20 + $0x3f0] sm:$0xff]  ;;  %v3046_v3 = vld [vmem:[%s3821_s2] sm:$0xff] }
  0x3c   :  { %2080 = vmatpush1.bf16.msra.mxu0 %v2079_v12  ;;  %v2107_v12 = vpack.c.bf16 %v325_v9, %v321_v8  ;;  %v544_v38 = vld [vmem:[%s3820_s10 + $0x10] sm:$0xff]  ;;  %v553_v53 = vld [vmem:[%s3820_s10 + $0x58] sm:$0xff] }
  0x3d   :  { %2082 = vmatprep.subr.bf16.mxu0 %v2081_v15  ;;  %v333_v15 = vld [vmem:[%s3838_s20 + $0x330] sm:$0xff]  ;;  %v557_v60 = vld [vmem:[%s3820_s10 + $0x78] sm:$0xff] }
  0x3e   :  { %2048 = vmatpush1.bf16.msra.mxu1 %v2047_v17  ;;  %v342_v17 = vld [vmem:[%s3838_s20 + $0x378] sm:$0xff]  ;;  %v2111_v18 = vpack.c.bf16 %v333_v15, %v329_v14  ;;  %v548_v45 = vld [vmem:[%s3820_s10 + $0x30] sm:$0xff] }
  0x3f   :  { %2050 = vmatprep.subr.bf16.mxu1 %v2049_v21  ;;  %v2113_v19 = vpack.c.bf16 %v342_v17, %v338_v16  ;;  %v341_v21 = vld [vmem:[%s3838_s20 + $0x370] sm:$0xff] }
  0x40   :  { %2084 = vmatpush1.bf16.msra.mxu0 %v2083_v26  ;;  %v2115_v24 = vpack.c.bf16 %v341_v21, %v337_v20  ;;  %v345_v26 = vld [vmem:[%s3838_s20 + $0x390] sm:$0xff]  ;;  %v359_v21 = vld [vmem:[%s3822_s5] sm:$0xf] }
  0x41   :  { %2086 = vmatprep.subr.bf16.mxu0 %v2085_v28  ;;  %v354_v28 = vld [vmem:[%s3838_s20 + $0x3d8] sm:$0xff]  ;;  %v2119_v30 = vpack.c.bf16 %v349_v27, %v345_v26  ;;  %v552_v52 = vld [vmem:[%s3820_s10 + $0x50] sm:$0xff] }
  0x42   :  { %2052 = vmatpush1.bf16.msra.mxu1 %v2051_v31  ;;  %v2121_v31 = vpack.c.bf16 %v358_v29, %v354_v28  ;;  %v556_v59 = vld [vmem:[%s3820_s10 + $0x70] sm:$0xff] }
  0x43   :  { %2054 = vmatprep.subr.bf16.mxu1 %v2053_v34  ;;  %v2123_v34 = vpack.c.bf16 %v357_v33, %v353_v32  ;;  %v2147_v62 = vpack.c.bf16 %v557_v60, %v556_v59  ;;  %v1750_v59 = vld [vmem:[%s3824_s9] ss:$0 sm:$0xff] }
  0x44   :  { %2088 = vmatpush1.bf16.msra.mxu0 %v2087_v39  ;;  %v2126_v39 = vpack.c.bf16 %v543_v37, %v542_v36 }
  0x45   :  { %2090 = vmatprep.subr.bf16.mxu0 %v2089_v40  ;;  %v545_v40 = vld [vmem:[%s3820_s10 + $0x18] sm:$0xff] }
  0x46   :  { %2056 = vmatpush1.bf16.msra.mxu1 %v2055_v43  ;;  %v2129_v41 = vpack.c.bf16 %v545_v40, %v544_v38  ;;  %v547_v43 = vld [vmem:[%s3820_s10 + $0x28] sm:$0xff] }
  0x47   :  { %2058 = vmatprep.subr.bf16.mxu1 %v2057_v46  ;;  %v2132_v44 = vpack.c.bf16 %v547_v43, %v546_v42  ;;  %v549_v46 = vld [vmem:[%s3820_s10 + $0x38] sm:$0xff] }
  0x48   :  { %2092 = vmatpush1.bf16.msra.mxu0 %v2091_v50  ;;  %v2135_v47 = vpack.c.bf16 %v549_v46, %v548_v45  ;;  %v551_v50 = vld [vmem:[%s3820_s10 + $0x48] sm:$0xff] }
  0x49   :  { %2094 = vmatprep.subr.bf16.mxu0 %v2093_v51  ;;  %v2138_v51 = vpack.c.bf16 %v551_v50, %v550_v48 }
  0x4a   :  { %2060 = vmatpush1.bf16.msra.mxu1 %v2059_v54  ;;  %v2141_v54 = vpack.c.bf16 %v553_v53, %v552_v52 }
  0x4b   :  { %2125 = vmatprep.subr.bf16.mxu1 %v2412_v35 }
  0x4c   :  { %2096 = vmatpush1.bf16.msra.mxu0 %v2095_v57  ;;  %v2414_v57 = vmov 0.0  }
  0x4d   :  { %446 = vmatmul.mubr.f32.vlgmr.msra.gmra.mrb[0].mxu1 %v205_v61  ;;  %2098 = vmatprep.subr.bf16.mxu0 %v2097_v58  ;;  %v2144_v58 = vpack.c.bf16 %v555_v56, %v554_v55 }
  0x4e   :  { %2127 = vmatpush3.bf16.msra.mxu1 %v2126_v39  ;;  %1927 = vmatprep.mubr.msk.f32.mxu1 %vm2413_vm0, %v2414_v57 }
  0x4f   :  { %2128 = vmatprep.subr.bf16.mxu1 %v2412_v35 }
  0x50   :  { %2100 = vmatpush1.bf16.msra.mxu0 %v2099_v0 }
  0x51   :  { %2102 = vmatprep.subr.bf16.mxu0 %v2101_v1 }
  0x52   :  { %2130 = vmatpush3.bf16.msra.mxu1 %v2129_v41 }
  0x53   :  { %2131 = vmatprep.subr.bf16.mxu1 %v2412_v35 }
  0x54   :  { %2104 = vmatpush1.bf16.msra.mxu0 %v2103_v6 }
  0x55   :  { %2106 = vmatprep.subr.bf16.mxu0 %v2105_v7 }
  0x56   :  { %2133 = vmatpush3.bf16.msra.mxu1 %v2132_v44 }
  0x57   :  { %2134 = vmatprep.subr.bf16.mxu1 %v2412_v35 }
  0x58   :  { %2108 = vmatpush1.bf16.msra.mxu0 %v2107_v12 }
  0x59   :  { %2110 = vmatprep.subr.bf16.mxu0 %v2109_v13 }
  0x5a   :  { %2136 = vmatpush3.bf16.msra.mxu1 %v2135_v47 }
  0x5b   :  { %2137 = vmatprep.subr.bf16.mxu1 %v2412_v35 }
  0x5c   :  { %2112 = vmatpush1.bf16.msra.mxu0 %v2111_v18 }
  0x5d   :  { %2114 = vmatprep.subr.bf16.mxu0 %v2113_v19 }
  0x5e   :  { %2139 = vmatpush3.bf16.msra.mxu1 %v2138_v51  ;;  %v2415_v51 = vmov 1966171168  }
  0x5f   :  { %2140 = vmatprep.subr.bf16.mxu1 %v2412_v35  ;;  %v646_v52 = vunpack.c.l.s4 %v2415_v51 }
  0x60   :  { %2116 = vmatpush1.bf16.msra.mxu0 %v2115_v24 }
  0x61   :  { %2118 = vmatprep.subr.bf16.mxu0 %v2117_v25  ;;  %v647_v53 = vunpack.c.0.s8 %v646_v52 }
  0x62   :  { %2142 = vmatpush3.bf16.msra.mxu1 %v2141_v54  ;;  %v1753_v54 = vld [vmem:[%s3823_s11] ss:$0 sm:$0xff] }
  0x63   :  { %2143 = vmatprep.subr.bf16.mxu1 %v2412_v35 }
  0x64   :  { %2120 = vmatpush1.bf16.msra.mxu0 %v2119_v30 }
  0x65   :  { %2122 = vmatprep.subr.bf16.mxu0 %v2121_v31 }
  0x66   :  { %2145 = vmatpush3.bf16.msra.mxu1 %v2144_v58 }
  0x67   :  { %2146 = vmatprep.subr.bf16.mxu1 %v2412_v35 }
  0x68   :  { %2124 = vmatpush1.bf16.msra.mxu0 %v2123_v34 }
  0x6a   :  { %2148 = vmatpush3.bf16.msra.mxu1 %v2147_v62 }
  0x6b   :  { %517 = vmatmul.mubr.f32.vlgmr.msra.gmra.mrb[8].mxu0 %v205_v61  ;;  %v361_v61 = vlaneseq }
  0x6d   :  { %v3032_v63 = vshrl.u32 %v361_v61, 7 }
  0x6f   :  { %v3035_v0 = vsub.s32 0, %v3032_v63  ;;  %v3038_v1 = vsub.s32 1, %v3032_v63  ;;  %v3041_v2 = vsub.s32 4, %v3032_v63  ;;  %v3049_v4 = vsub.s32 2, %v3032_v63 }
  0x70   :  { %v3060_v9 = vsub.s32 3, %v3032_v63  ;;  %v3065_v11 = vsub.s32 5, %v3032_v63  ;;  %v650_v55 = vsub.s32 %v647_v53, %v3032_v63 }
  0x71   :  { %v792_v5 = vrot.slane %v3046_v3, %v3038_v1  ;;  %v785_v6 = vrot.slane %v3046_v3, %v3035_v0  ;;  %v799_v7 = vrot.slane %v3046_v3, %v3049_v4  ;;  %v813_v8 = vrot.slane %v3046_v3, %v3041_v2 }
  0x72   :  { %v806_v10 = vrot.slane %v3046_v3, %v3060_v9  ;;  %v820_v12 = vrot.slane %v3046_v3, %v3065_v11  ;;  %v364_v22 = vrot.slane %v359_v21, %v3035_v0  ;;  %v368_v27 = vrot.slane %v359_v21, %v3038_v1 }
  0x73   :  { %794 = vbcast.lane.b32.xlu1 %v792_v5, 256  ;;  %787 = vbcast.lane.b32.xlu0 %v785_v6, 256  ;;  %v376_v33 = vrot.slane %v359_v21, %v3060_v9  ;;  %v372_v36 = vrot.slane %v359_v21, %v3049_v4 }
  0x77   :  { %801 = vbcast.lane.b32.xlu1 %v799_v7, 256  ;;  %815 = vbcast.lane.b32.xlu0 %v813_v8, 256 }
  0x7b   :  { %808 = vbcast.lane.b32.xlu1 %v806_v10, 256 }
  0x7f   :  { %822 = vbcast.lane.b32.xlu1 %v820_v12, 256 }
  0xfe   :  { %v1885_v13 = vpop.f32.mrb[0].mxu0 }
  0xff   :  { %v158_v14 = vpop.f32.mrb[1].mxu0  ;;  %v164_v8 = vadd.f32 %v1885_v13, %v1750_v59 }
 0x100   :  { %v159_v10 = vadd.f32 %v1750_v59, %v158_v14 }
 0x102   :  { %v1888_v15 = vpop.f32.mrb[2].mxu0 }
 0x103   :  { %v168_v16 = vpop.f32.mrb[3].mxu0  ;;  %v174_v12 = vadd.f32 %v1888_v15, %v1750_v59 }
 0x104   :  { %v169_v21 = vadd.f32 %v1750_v59, %v168_v16 }
 0x106   :  { %v3069_v17 = vpop.f32.mrb[4].mxu0 }
 0x107   :  { %v3071_v18 = vpop.f32.mrb[5].mxu0 }
 0x10a   :  { %v3073_v19 = vpop.f32.mrb[6].mxu0 }
 0x10b   :  { %v3075_v20 = vpop.f32.mrb[7].mxu0 }
 0x10c   :  { %v189_v14 = vadd.f32 %v1750_v59, %v3075_v20 }
 0x120   :  { %v447_v23 = vpop.f32.mrb[0].mxu1 }
 0x121   :  { %v448_v24 = vadd.f32 %v447_v23, %v364_v22  ;;  %v449_v25 = vpop.f32.mrb[1].mxu1 }
 0x122   :  { %v450_v28 = vadd.f32 %v449_v25, %v368_v27  ;;  %v179_v27 = vadd.f32 %v1750_v59, %v3071_v18 }
 0x123   :  { %v1751_v26 = vmul.f32 -1.442695, %v448_v24 }
 0x124   :  { %v1752_v29 = vmul.f32 -1.442695, %v450_v28  ;;  %v194_v28 = vadd.f32 %v3073_v19, %v1750_v59 }
 0x125   :  { %2340 = vpow2.f32 %v1751_v26  ;;  %v184_v26 = vadd.f32 %v3069_v17, %v1750_v59 }
 0x126   :  { %2342 = vpow2.f32 %v1752_v29 }
 0x12f   :  { %v2341_v30 = vpop.eup %2340 }
 0x130   :  { %v526_v31 = vadd.f32 1.0, %v2341_v30  ;;  %v2343_v32 = vpop.eup %2342 }
 0x131   :  { %v532_v34 = vadd.f32 1.0, %v2343_v32 }
 0x132   :  { %2344 = vrcp.f32 %v526_v31 }
 0x133   :  { %2346 = vrcp.f32 %v532_v34 }
 0x13c   :  { %v2345_v38 = vpop.eup %2344 }
 0x13d   :  { %v2347_v44 = vpop.eup %2346 }
 0x13e   :  { %v518_v37 = vpop.f32.mrb[8].mxu0  ;;  %v538_v45 = vsub.f32 1.0, %v2347_v44  ;;  %v540_v48 = vmul.f32 %v2347_v44, %v2744_v49 }
 0x13f   :  { %v520_v39 = vpop.f32.mrb[9].mxu0  ;;  %v519_v41 = vadd.f32 %v518_v37, %v372_v36 }
 0x140   :  { %v521_v40 = vadd.f32 %v520_v39, %v376_v33 }
 0x142   :  { %v535_v42 = vmul.f32 %v2345_v38, %v521_v40 }
 0x144   :  { %v536_v43 = vadd.f32 %v535_v42, %v519_v41 }
 0x146   :  { %2348 = vtanh.f32 %v536_v43  ;;  %v1754_v43 = vld [vmem:[%s3825_s12] ss:$0 sm:$0xff] }
 0x150   :  { %v2349_v46 = vpop.eup %2348 }
 0x151   :  { %v539_v47 = vmul.f32 %v2349_v46, %v538_v45 }
 0x153   :  { %v3085_v50 = vadd.f32 %v540_v48, %v539_v47 }
 0x155   :  { %1928 = vmatmul.mubr.f32.vlgmr.msra.gmra.mrb[2].mxu1 %v3085_v50  ;;  %1462 = vmatprep.mubr.f32.mxu0 %v3085_v50 }
 0x156   :  { %1533 = vmatprep.mubr.f32.mxu1 %v3085_v50 }
 0x228   :  { %v631_v56 = vpop.f32.mrb[2].mxu1 }
 0x229   :  { %v632_v58 = vadd.f32 %v1753_v54, %v631_v56  ;;  %v1929_v49 = vpop.f32.mrb[3].mxu1 }
 0x22b   :  { %v644_v60 = vcombine.high %v632_v58, %v632_v58  ;;  %v651_v62 = vrot.slane %v632_v58, %v650_v55 }
 0x22d   :  { %v658_v5 = vrot.slane %v644_v60, %v650_v55  ;;  %v659_v6 = vcombine.high %v651_v62, %v651_v62  ;;  %v667_v7 = vrot.slane %v651_v62, %v650_v55 }
 0x22f   :  { %v660_v22 = vcombine.high %v658_v5, %v658_v5  ;;  %v674_v23 = vrot.slane %v658_v5, %v650_v55  ;;  %v681_v24 = vrot.slane %v659_v6, %v650_v55  ;;  %v689_v25 = vcombine.high %v667_v7, %v667_v7 }
 0x230   :  { %v696_v29 = vrot.slane %v667_v7, %v3035_v0  ;;  %v2416_v5 = vmov 0   ;;  %v3113_v6 = vsub.s32 7, %v3032_v63  ;;  %v3116_v7 = vsub.s32 6, %v3032_v63 }
 0x231   :  { %v688_v30 = vrot.slane %v660_v22, %v650_v55  ;;  %v690_v31 = vcombine.high %v674_v23, %v674_v23  ;;  %v691_v32 = vcombine.high %v681_v24, %v681_v24  ;;  %v700_v13 = vrot.slane %v681_v24, %v3035_v0  ;;  %2338 = vset.pattern.permute.xlu0 %v2416_v5  ;;  %v788_v22 = vpop.permute.xlu0 %787 }
 0x232   :  { %v704_v15 = vrot.slane %v689_v25, %v3035_v0  ;;  %v712_v16 = vrot.slane %v674_v23, %v3035_v0  ;;  %v733_v33 = vadd.f32 %v696_v29, %v159_v10  ;;  %2339 = vset.pattern.permute.xlu1 %v2416_v5  ;;  %v827_v10 = vrot.slane %v3046_v3, %v3116_v7 }
 0x233   :  { %v692_v34 = vcombine.high %v688_v30, %v688_v30  ;;  %v708_v17 = vrot.slane %v691_v32, %v3035_v0  ;;  %v716_v18 = vrot.slane %v688_v30, %v3035_v0  ;;  %v720_v19 = vrot.slane %v690_v31, %v3035_v0 }
 0x234   :  { %v734_v36 = vadd.f32 %v700_v13, %v164_v8  ;;  %v735_v37 = vadd.f32 %v704_v15, %v169_v21  ;;  %v737_v38 = vadd.f32 %v712_v16, %v179_v27  ;;  %2350 = vtanh.f32 %v733_v33 }
 0x235   :  { %v724_v39 = vrot.slane %v692_v34, %v3035_v0  ;;  %v736_v40 = vadd.f32 %v708_v17, %v174_v12  ;;  %v738_v20 = vadd.f32 %v716_v18, %v184_v26  ;;  %v739_v41 = vadd.f32 %v720_v19, %v189_v14  ;;  %v795_v12 = vpop.permute.xlu1 %794  ;;  %v816_v24 = vpop.permute.xlu0 %815 }
 0x236   :  { %2352 = vtanh.f32 %v734_v36  ;;  %v834_v8 = vrot.slane %v3046_v3, %v3113_v6 }
 0x237   :  { %2354 = vtanh.f32 %v735_v37  ;;  %v740_v42 = vadd.f32 %v724_v39, %v194_v28  ;;  %v887_v37 = vand.u32 127, %v361_v61 }
 0x238   :  { %2356 = vtanh.f32 %v736_v40 }
 0x239   :  { %2358 = vtanh.f32 %v737_v38  ;;  %v802_v21 = vpop.permute.xlu1 %801  ;;  %v3139_v39 = vsub.s32 %v887_v37, %v3032_v63 }
 0x23a   :  { %2360 = vtanh.f32 %v738_v20 }
 0x23b   :  { %2362 = vtanh.f32 %v739_v41 }
 0x23c   :  { %2364 = vtanh.f32 %v740_v42 }
 0x23d   :  { %v809_v23 = vpop.permute.xlu1 %808 }
 0x23e   :  { %v2351_v44 = vpop.eup %2350 }
 0x23f   :  { %v756_v45 = vmul.f32 %v2351_v44, %v1754_v43 }
 0x240   :  { %v2353_v46 = vpop.eup %2352 }
 0x241   :  { %v2355_v47 = vpop.eup %2354  ;;  %764 = vadd.xlane.f32.xlu0 %v756_v45  ;;  %v757_v52 = vmul.f32 %v2353_v46, %v1754_v43  ;;  %v823_v25 = vpop.permute.xlu1 %822 }
 0x242   :  { %v758_v48 = vmul.f32 %v2355_v47, %v1754_v43  ;;  %v2357_v51 = vpop.eup %2356 }
 0x243   :  { %v2359_v53 = vpop.eup %2358  ;;  %v759_v54 = vmul.f32 %v2357_v51, %v1754_v43 }
 0x244   :  { %768 = vadd.xlane.f32.xlu1 %v758_v48  ;;  %v2361_v55 = vpop.eup %2360  ;;  %v760_v56 = vmul.f32 %v2359_v53, %v1754_v43 }
 0x245   :  { %766 = vadd.xlane.f32.xlu0 %v757_v52  ;;  %v2363_v58 = vpop.eup %2362  ;;  %v761_v49 = vmul.f32 %v2361_v55, %v1754_v43 }
 0x246   :  { %v2365_v59 = vpop.eup %2364  ;;  %v762_v60 = vmul.f32 %v2363_v58, %v1754_v43 }
 0x247   :  { %v763_v62 = vmul.f32 %v2365_v59, %v1754_v43 }
 0x248   :  { %770 = vadd.xlane.f32.xlu1 %v759_v54 }
 0x249   :  { %772 = vadd.xlane.f32.xlu0 %v760_v56 }
 0x24c   :  { %774 = vadd.xlane.f32.xlu1 %v761_v49 }
 0x24d   :  { %776 = vadd.xlane.f32.xlu0 %v762_v60 }
 0x250   :  { %778 = vadd.xlane.f32.xlu1 %v763_v62 }
 0x261   :  { %836 = vbcast.lane.b32.xlu1 %v834_v8, 256 }
 0x263   :  { %829 = vbcast.lane.b32.xlu0 %v827_v10, 256 }
 0x2ce   :  { %v765_v26 = vpop.xlane.xlu0 %764 }
 0x2cf   :  { %v3122_v27 = vadd.f32 %v788_v22, %v765_v26 }
 0x2d1   :  { %v769_v28 = vpop.xlane.xlu1 %768  ;;  %863 = vperm.xlu0 %2338, %v3122_v27  }
 0x2d2   :  { %v767_v29 = vpop.xlane.xlu0 %766  ;;  %v848_v13 = vadd.f32 %v802_v21, %v769_v28 }
 0x2d3   :  { %v847_v30 = vadd.f32 %v795_v12, %v767_v29 }
 0x2d5   :  { %v771_v31 = vpop.xlane.xlu1 %770  ;;  %866 = vperm.xlu1 %2339, %v847_v30  }
 0x2d6   :  { %v3125_v32 = vadd.f32 %v809_v23, %v771_v31  ;;  %v773_v3 = vpop.xlane.xlu0 %772 }
 0x2d7   :  { %v850_v33 = vadd.f32 %v816_v24, %v773_v3 }
 0x2d8   :  { %872 = vperm.xlu0 %2338, %v3125_v32  }
 0x2d9   :  { %v775_v14 = vpop.xlane.xlu1 %774  ;;  %869 = vperm.xlu1 %2339, %v848_v13  }
 0x2da   :  { %v3128_v15 = vadd.f32 %v823_v25, %v775_v14  ;;  %v777_v16 = vpop.xlane.xlu0 %776 }
 0x2dc   :  { %878 = vperm.xlu0 %2338, %v3128_v15  }
 0x2dd   :  { %v779_v34 = vpop.xlane.xlu1 %778  ;;  %875 = vperm.xlu1 %2339, %v850_v33  }
 0x2de   :  { %v830_v17 = vpop.permute.xlu0 %829 }
 0x2df   :  { %v3131_v18 = vadd.f32 %v830_v17, %v777_v16 }
 0x2e1   :  { %v837_v19 = vpop.permute.xlu1 %836  ;;  %881 = vperm.xlu1 %2339, %v3131_v18  }
 0x2e2   :  { %v3134_v36 = vadd.f32 %v837_v19, %v779_v34 }
 0x2e4   :  { %884 = vperm.xlu0 %2338, %v3134_v36  }
 0x350   :  { %v864_v38 = vpop.permute.xlu0 %863 }
 0x351   :  { %v891_v42 = vrot.slane %v864_v38, %v3139_v39 }
 0x354   :  { %v867_v40 = vpop.permute.xlu1 %866 }
 0x355   :  { %v895_v20 = vrot.slane %v867_v40, %v3139_v39 }
 0x357   :  { %v873_v41 = vpop.permute.xlu0 %872  ;;  %v921_v45 = vsel %vm920_vm1, %v895_v20, %v891_v42 }
 0x358   :  { %v870_v43 = vpop.permute.xlu1 %869  ;;  %v903_v61 = vrot.slane %v873_v41, %v3139_v39 }
 0x359   :  { %v899_v44 = vrot.slane %v870_v43, %v3139_v39 }
 0x35b   :  { %v923_v46 = vsel %vm922_vm2, %v899_v44, %v921_v45  ;;  %v879_v47 = vpop.permute.xlu0 %878 }
 0x35c   :  { %v876_v63 = vpop.permute.xlu1 %875  ;;  %v925_v51 = vsel %vm924_vm3, %v903_v61, %v923_v46  ;;  %v911_v53 = vrot.slane %v879_v47, %v3139_v39 }
 0x35d   :  { %v907_v48 = vrot.slane %v876_v63, %v3139_v39 }
 0x35f   :  { %v927_v52 = vsel %vm926_vm4, %v907_v48, %v925_v51 }
 0x360   :  { %v882_v54 = vpop.permute.xlu1 %881  ;;  %v929_v56 = vsel %vm928_vm5, %v911_v53, %v927_v52 }
 0x361   :  { %v915_v55 = vrot.slane %v882_v54, %v3139_v39 }
 0x363   :  { %v885_v58 = vpop.permute.xlu0 %884  ;;  %v931_v49 = vsel %vm930_vm6, %v915_v55, %v929_v56 }
 0x364   :  { %v919_v59 = vrot.slane %v885_v58, %v3139_v39 }
 0x366   :  { %v933_v60 = vsel %vm932_vm7, %v919_v59, %v931_v49 }
 0x367   :  { %v936_v62 = vsel %vm935_vm8, %v933_v60, -inf }
 0x368   :  { %937 = vmax.xlane.f32.xlu1 %v936_v62 }
 0x3f5   :  { %v938_v5 = vpop.xlane.xlu1 %937 }
 0x3f6   :  { %v943_v8 = vrot.slane %v938_v5, %v3035_v0  ;;  %v947_v10 = vrot.slane %v938_v5, %v3038_v1  ;;  %v951_v12 = vrot.slane %v938_v5, %v3049_v4  ;;  %v955_v24 = vrot.slane %v938_v5, %v3060_v9 }
 0x3f7   :  { %v959_v28 = vrot.slane %v938_v5, %v3041_v2  ;;  %v963_v3 = vrot.slane %v938_v5, %v3065_v11 }
 0x3f8   :  { %v980_v21 = vsub.f32 %v3122_v27, %v943_v8  ;;  %v981_v22 = vsub.f32 %v847_v30, %v947_v10  ;;  %v982_v25 = vsub.f32 %v848_v13, %v951_v12  ;;  %v983_v29 = vsub.f32 %v3125_v32, %v955_v24  ;;  %v1251_v24 = vld [vmem:[%s3826_s6 + $0x18] sm:$0xff] }
 0x3f9   :  { %v984_v14 = vsub.f32 %v850_v33, %v959_v28  ;;  %v967_v27 = vrot.slane %v938_v5, %v3116_v7  ;;  %v985_v30 = vsub.f32 %v3128_v15, %v963_v3  ;;  %v971_v32 = vrot.slane %v938_v5, %v3113_v6  ;;  %v1252_v28 = vld [vmem:[%s3826_s6 + $0x20] sm:$0xff]  ;;  %v1250_v3 = vld [vmem:[%s3826_s6 + $0x10] sm:$0xff] }
 0x3fa   :  { %v988_v23 = vmul.f32 1.442695, %v980_v21  ;;  %v990_v26 = vmul.f32 1.442695, %v981_v22  ;;  %v992_v31 = vmul.f32 1.442695, %v982_v25 }
 0x3fb   :  { %v994_v16 = vmul.f32 1.442695, %v983_v29  ;;  %v996_v13 = vmul.f32 1.442695, %v984_v14  ;;  %v986_v33 = vsub.f32 %v3131_v18, %v967_v27  ;;  %v998_v19 = vmul.f32 1.442695, %v985_v30 }
 0x3fc   :  { %2366 = vpow2.f32 %v988_v23  ;;  %v987_v38 = vsub.f32 %v3134_v36, %v971_v32  ;;  %v1249_v22 = vld [vmem:[%s3826_s6 + $0x8] sm:$0xff]  ;;  %v1255_v25 = vld [vmem:[%s3826_s6 + $0x38] sm:$0xff]  ;;  %v1254_v14 = vld [vmem:[%s3826_s6 + $0x30] sm:$0xff] }
 0x3fd   :  { %2368 = vpow2.f32 %v990_v26  ;;  %v1000_v15 = vmul.f32 1.442695, %v986_v33  ;;  %v1253_v23 = vld [vmem:[%s3826_s6 + $0x28] sm:$0xff]  ;;  %v1248_v26 = vld [vmem:[%s3826_s6] sm:$0xff]  ;;  %v2213_v29 = vpack.c.bf16 %v1255_v25, %v1251_v24  ;;  %v2215_v27 = vpack.c.bf16 %v1254_v14, %v1250_v3  ;;  %v1263_v32 = vld [vmem:[%s3826_s6 + $0x78] sm:$0xff] }
 0x3fe   :  { %2370 = vpow2.f32 %v992_v31  ;;  %v1002_v20 = vmul.f32 1.442695, %v987_v38  ;;  %v2151_v31 = vpack.c.bf16 %v1252_v28, %v1248_v26  ;;  %v1261_v30 = vld [vmem:[%s3826_s6 + $0x68] sm:$0xff]  ;;  %v1256_v38 = vld [vmem:[%s3826_s6 + $0x40] sm:$0xff]  ;;  %v1287_v25 = vld [vmem:[%s3826_s6 + $0x138] sm:$0xff] }
 0x3ff   :  { %2372 = vpow2.f32 %v994_v16  ;;  %v1257_v16 = vld [vmem:[%s3826_s6 + $0x48] sm:$0xff]  ;;  %2214 = vmatprep.subr.bf16.mxu1 %v2213_v29  ;;  %v1284_v3 = vld [vmem:[%s3826_s6 + $0x120] sm:$0xff]  ;;  %v1282_v14 = vld [vmem:[%s3826_s6 + $0x110] sm:$0xff] }
 0x400   :  { %2374 = vpow2.f32 %v996_v13  ;;  %v1259_v13 = vld [vmem:[%s3826_s6 + $0x58] sm:$0xff]  ;;  %v2153_v33 = vpack.c.bf16 %v1261_v30, %v1257_v16  ;;  %2216 = vmatpush1.bf16.msra.mxu1 %v2215_v27  ;;  %v1285_v24 = vld [vmem:[%s3826_s6 + $0x128] sm:$0xff]  ;;  %v1286_v27 = vld [vmem:[%s3826_s6 + $0x130] sm:$0xff] }
 0x401   :  { %2376 = vpow2.f32 %v998_v19  ;;  %v2217_v19 = vpack.c.bf16 %v1263_v32, %v1259_v13  ;;  %v1289_v30 = vld [vmem:[%s3826_s6 + $0x148] sm:$0xff]  ;;  %v1291_v32 = vld [vmem:[%s3826_s6 + $0x158] sm:$0xff] }
 0x402   :  { %2378 = vpow2.f32 %v1000_v15  ;;  %v1260_v15 = vld [vmem:[%s3826_s6 + $0x60] sm:$0xff]  ;;  %v1293_v13 = vld [vmem:[%s3826_s6 + $0x168] sm:$0xff] }
 0x403   :  { %2380 = vpow2.f32 %v1002_v20  ;;  %v1258_v20 = vld [vmem:[%s3826_s6 + $0x50] sm:$0xff]  ;;  %2218 = vmatprep.subr.bf16.mxu1 %v2217_v19 }
 0x406   :  { %v3165_v34 = vpop.eup %2366 }
 0x407   :  { %1013 = vperm.xlu0 %2338, %v3165_v34   ;;  %v3170_v17 = vpop.eup %2368 }
 0x408   :  { %v3175_v37 = vpop.eup %2370 }
 0x409   :  { %v3179_v40 = vpop.eup %2372 }
 0x40a   :  { %v3182_v41 = vpop.eup %2374 }
 0x40b   :  { %1016 = vperm.xlu0 %2338, %v3170_v17   ;;  %v3185_v18 = vpop.eup %2376 }
 0x40c   :  { %v3188_v42 = vpop.eup %2378 }
 0x40d   :  { %v3191_v36 = vpop.eup %2380 }
 0x40f   :  { %1019 = vperm.xlu0 %2338, %v3175_v37  }
 0x413   :  { %1022 = vperm.xlu0 %2338, %v3179_v40  }
 0x417   :  { %1025 = vperm.xlu0 %2338, %v3182_v41  }
 0x41b   :  { %1028 = vperm.xlu0 %2338, %v3185_v18  }
 0x41f   :  { %1031 = vperm.xlu0 %2338, %v3188_v42  }
 0x423   :  { %1034 = vperm.xlu0 %2338, %v3191_v36  }
 0x486   :  { %v1014_v43 = vpop.permute.xlu0 %1013 }
 0x487   :  { %v1039_v51 = vrot.slane %v1014_v43, %v3139_v39  ;;  %v2155_v43 = vpack.c.bf16 %v1260_v15, %v1256_v38  ;;  %v2231_v38 = vpack.c.bf16 %v1286_v27, %v1282_v14  ;;  %v2169_v15 = vpack.c.bf16 %v1293_v13, %v1289_v30  ;;  %v1308_v14 = vld [vmem:[%s3826_s6 + $0x1e0] sm:$0xff]  ;;  %v1306_v30 = vld [vmem:[%s3826_s6 + $0x1d0] sm:$0xff] }
 0x488   :  { %v1310_v13 = vld [vmem:[%s3826_s6 + $0x1f0] sm:$0xff] }
 0x48a   :  { %v1017_v44 = vpop.permute.xlu0 %1016 }
 0x48b   :  { %v1043_v47 = vrot.slane %v1017_v44, %v3139_v39  ;;  %v1262_v44 = vld [vmem:[%s3826_s6 + $0x70] sm:$0xff] }
 0x48d   :  { %v1068_v55 = vsel %vm920_vm1, %v1043_v47, %v1039_v51  ;;  %v1267_v47 = vld [vmem:[%s3826_s6 + $0x98] sm:$0xff]  ;;  %v1264_v51 = vld [vmem:[%s3826_s6 + $0x80] sm:$0xff] }
 0x48e   :  { %v1020_v45 = vpop.permute.xlu0 %1019 }
 0x48f   :  { %v1047_v48 = vrot.slane %v1020_v45, %v3139_v39  ;;  %v1265_v45 = vld [vmem:[%s3826_s6 + $0x88] sm:$0xff] }
 0x491   :  { %v1069_v58 = vsel %vm922_vm2, %v1047_v48, %v1068_v55  ;;  %v1271_v48 = vld [vmem:[%s3826_s6 + $0xb8] sm:$0xff]  ;;  %v1270_v55 = vld [vmem:[%s3826_s6 + $0xb0] sm:$0xff] }
 0x492   :  { %v1023_v46 = vpop.permute.xlu0 %1022 }
 0x493   :  { %v1051_v52 = vrot.slane %v1023_v46, %v3139_v39  ;;  %v1269_v46 = vld [vmem:[%s3826_s6 + $0xa8] sm:$0xff] }
 0x495   :  { %v1070_v59 = vsel %vm924_vm3, %v1051_v52, %v1069_v58  ;;  %v2221_v52 = vpack.c.bf16 %v1271_v48, %v1267_v47  ;;  %v1273_v58 = vld [vmem:[%s3826_s6 + $0xc8] sm:$0xff]  ;;  %v1299_v47 = vld [vmem:[%s3826_s6 + $0x198] sm:$0xff] }
 0x496   :  { %v1026_v61 = vpop.permute.xlu0 %1025  ;;  %v1303_v48 = vld [vmem:[%s3826_s6 + $0x1b8] sm:$0xff] }
 0x497   :  { %v1055_v53 = vrot.slane %v1026_v61, %v3139_v39  ;;  %v2219_v61 = vpack.c.bf16 %v1262_v44, %v1258_v20  ;;  %v1288_v20 = vld [vmem:[%s3826_s6 + $0x140] sm:$0xff]  ;;  %v1290_v44 = vld [vmem:[%s3826_s6 + $0x150] sm:$0xff] }
 0x499   :  { %v1071_v60 = vsel %vm926_vm4, %v1055_v53, %v1070_v59  ;;  %v1268_v53 = vld [vmem:[%s3826_s6 + $0xa0] sm:$0xff]  ;;  %v1275_v59 = vld [vmem:[%s3826_s6 + $0xd8] sm:$0xff]  ;;  %2220 = vmatpush1.bf16.msra.mxu1 %v2219_v61  ;;  %v1297_v61 = vld [vmem:[%s3826_s6 + $0x188] sm:$0xff] }
 0x49a   :  { %v1029_v63 = vpop.permute.xlu0 %1028  ;;  %2222 = vmatprep.subr.bf16.mxu1 %v2221_v52 }
 0x49b   :  { %v1059_v56 = vrot.slane %v1029_v63, %v3139_v39  ;;  %v2157_v63 = vpack.c.bf16 %v1269_v46, %v1265_v45  ;;  %v1294_v46 = vld [vmem:[%s3826_s6 + $0x170] sm:$0xff] }
 0x49c   :  { %v2235_v52 = vpack.c.bf16 %v1294_v46, %v1290_v44  ;;  %v1312_v44 = vld [vmem:[%s3826_s6 + $0x200] sm:$0xff] }
 0x49d   :  { %v1072_v5 = vsel %vm928_vm5, %v1059_v56, %v1071_v60  ;;  %v2159_v56 = vpack.c.bf16 %v1268_v53, %v1264_v51 }
 0x49e   :  { %v1032_v54 = vpop.permute.xlu0 %1031 }
 0x49f   :  { %v1063_v49 = vrot.slane %v1032_v54, %v3139_v39  ;;  %v1266_v54 = vld [vmem:[%s3826_s6 + $0x90] sm:$0xff] }
 0x4a0   :  { %v2223_v60 = vpack.c.bf16 %v1270_v55, %v1266_v54  ;;  %v2237_v54 = vpack.c.bf16 %v1303_v48, %v1299_v47  ;;  %v1318_v47 = vld [vmem:[%s3826_s6 + $0x230] sm:$0xff] }
 0x4a1   :  { %v1073_v10 = vsel %vm930_vm6, %v1063_v49, %v1072_v5  ;;  %v1277_v49 = vld [vmem:[%s3826_s6 + $0xe8] sm:$0xff]  ;;  %v1279_v5 = vld [vmem:[%s3826_s6 + $0xf8] sm:$0xff] }
 0x4a2   :  { %v1035_v62 = vpop.permute.xlu0 %1034  ;;  %2224 = vmatpush1.bf16.msra.mxu1 %v2223_v60 }
 0x4a3   :  { %v1067_v8 = vrot.slane %v1035_v62, %v3139_v39  ;;  %v2149_v39 = vpack.c.bf16 %v1253_v23, %v1249_v22  ;;  %v2161_v62 = vpack.c.bf16 %v1277_v49, %v1273_v58  ;;  %v1278_v22 = vld [vmem:[%s3826_s6 + $0xf0] sm:$0xff]  ;;  %v1281_v23 = vld [vmem:[%s3826_s6 + $0x108] sm:$0xff] }
 0x4a4   :  { %v2165_v29 = vpack.c.bf16 %v1285_v24, %v1281_v23  ;;  %v1296_v24 = vld [vmem:[%s3826_s6 + $0x180] sm:$0xff] }
 0x4a5   :  { %v1074_v12 = vsel %vm932_vm7, %v1067_v8, %v1073_v10  ;;  %2150 = vmatprep.subr.bf16.mxu0 %v2149_v39  ;;  %v1272_v8 = vld [vmem:[%s3826_s6 + $0xc0] sm:$0xff]  ;;  %v1283_v39 = vld [vmem:[%s3826_s6 + $0x118] sm:$0xff] }
 0x4a6   :  { %v1076_v21 = vsel %vm935_vm8, %v1074_v12, 0.0  ;;  %2152 = vmatpush1.bf16.msra.mxu0 %v2151_v31  ;;  %v1276_v10 = vld [vmem:[%s3826_s6 + $0xe0] sm:$0xff]  ;;  %v2225_v12 = vpack.c.bf16 %v1279_v5, %v1275_v59  ;;  %v2229_v16 = vpack.c.bf16 %v1287_v25, %v1283_v39 }
 0x4a7   :  { %1077 = vadd.xlane.f32.xlu0 %v1076_v21  ;;  %2154 = vmatprep.subr.bf16.mxu0 %v2153_v33  ;;  %v1274_v21 = vld [vmem:[%s3826_s6 + $0xd0] sm:$0xff]  ;;  %v2163_v26 = vpack.c.bf16 %v1276_v10, %v1272_v8  ;;  %v1280_v31 = vld [vmem:[%s3826_s6 + $0x100] sm:$0xff]  ;;  %v1295_v33 = vld [vmem:[%s3826_s6 + $0x178] sm:$0xff] }
 0x4a8   :  { %v2227_v28 = vpack.c.bf16 %v1278_v22, %v1274_v21  ;;  %2226 = vmatprep.subr.bf16.mxu1 %v2225_v12  ;;  %v2167_v19 = vpack.c.bf16 %v1284_v3, %v1280_v31  ;;  %v2233_v45 = vpack.c.bf16 %v1295_v33, %v1291_v32  ;;  %v2243_v32 = vpack.c.bf16 %v1310_v13, %v1306_v30  ;;  %v1345_v13 = vld [vmem:[%s3826_s6 + $0x308] sm:$0xff] }
 0x4aa   :  { %2156 = vmatpush1.bf16.msra.mxu0 %v2155_v43  ;;  %2228 = vmatpush1.bf16.msra.mxu1 %v2227_v28  ;;  %v1292_v43 = vld [vmem:[%s3826_s6 + $0x160] sm:$0xff]  ;;  %v1309_v28 = vld [vmem:[%s3826_s6 + $0x1e8] sm:$0xff] }
 0x4ab   :  { %2158 = vmatprep.subr.bf16.mxu0 %v2157_v63  ;;  %2230 = vmatprep.subr.bf16.mxu1 %v2229_v16  ;;  %v1301_v63 = vld [vmem:[%s3826_s6 + $0x1a8] sm:$0xff]  ;;  %v2171_v51 = vpack.c.bf16 %v1292_v43, %v1288_v20 }
 0x4ac   :  { %v2173_v53 = vpack.c.bf16 %v1301_v63, %v1297_v61  ;;  %v1314_v63 = vld [vmem:[%s3826_s6 + $0x210] sm:$0xff] }
 0x4ad   :  { %v2247_v48 = vpack.c.bf16 %v1318_v47, %v1314_v63  ;;  %v1357_v63 = vld [vmem:[%s3826_s6 + $0x368] sm:$0xff]  ;;  %v1355_v47 = vld [vmem:[%s3826_s6 + $0x358] sm:$0xff] }
 0x4ae   :  { %2160 = vmatpush1.bf16.msra.mxu0 %v2159_v56  ;;  %2232 = vmatpush1.bf16.msra.mxu1 %v2231_v38  ;;  %v1317_v38 = vld [vmem:[%s3826_s6 + $0x228] sm:$0xff] }
 0x4af   :  { %2162 = vmatprep.subr.bf16.mxu0 %v2161_v62  ;;  %2234 = vmatprep.subr.bf16.mxu1 %v2233_v45  ;;  %v1316_v45 = vld [vmem:[%s3826_s6 + $0x220] sm:$0xff] }
 0x4b0   :  { %v2183_v61 = vpack.c.bf16 %v1316_v45, %v1312_v44  ;;  %v1346_v44 = vld [vmem:[%s3826_s6 + $0x310] sm:$0xff] }
 0x4b1   :  { %v1350_v45 = vld [vmem:[%s3826_s6 + $0x330] sm:$0xff] }
 0x4b2   :  { %2164 = vmatpush1.bf16.msra.mxu0 %v2163_v26  ;;  %2236 = vmatpush1.bf16.msra.mxu1 %v2235_v52  ;;  %v1305_v26 = vld [vmem:[%s3826_s6 + $0x1c8] sm:$0xff] }
 0x4b3   :  { %2166 = vmatprep.subr.bf16.mxu0 %v2165_v29  ;;  %2238 = vmatprep.subr.bf16.mxu1 %v2237_v54  ;;  %v1307_v29 = vld [vmem:[%s3826_s6 + $0x1d8] sm:$0xff]  ;;  %v2177_v3 = vpack.c.bf16 %v1309_v28, %v1305_v26  ;;  %v1321_v52 = vld [vmem:[%s3826_s6 + $0x248] sm:$0xff] }
 0x4b4   :  { %v1323_v54 = vld [vmem:[%s3826_s6 + $0x258] sm:$0xff]  ;;  %v1337_v26 = vld [vmem:[%s3826_s6 + $0x2c8] sm:$0xff] }
 0x4b5   :  { %v1341_v28 = vld [vmem:[%s3826_s6 + $0x2e8] sm:$0xff] }
 0x4b6   :  { %2168 = vmatpush1.bf16.msra.mxu0 %v2167_v19  ;;  %v1313_v19 = vld [vmem:[%s3826_s6 + $0x208] sm:$0xff] }
 0x4b7   :  { %2170 = vmatprep.subr.bf16.mxu0 %v2169_v15  ;;  %v1315_v15 = vld [vmem:[%s3826_s6 + $0x218] sm:$0xff]  ;;  %v2181_v43 = vpack.c.bf16 %v1317_v38, %v1313_v19 }
 0x4b8   :  { %v1351_v38 = vld [vmem:[%s3826_s6 + $0x338] sm:$0xff] }
 0x4ba   :  { %2172 = vmatpush1.bf16.msra.mxu0 %v2171_v51 }
 0x4bb   :  { %2174 = vmatprep.subr.bf16.mxu0 %v2173_v53  ;;  %v1325_v53 = vld [vmem:[%s3826_s6 + $0x268] sm:$0xff] }
 0x534   :  { %v1078_v55 = vpop.xlane.xlu0 %1077 }
 0x535   :  { %v1099_v56 = vrot.slane %v1078_v55, %v3041_v2  ;;  %v1083_v58 = vrot.slane %v1078_v55, %v3035_v0  ;;  %v1087_v49 = vrot.slane %v1078_v55, %v3038_v1  ;;  %v1091_v59 = vrot.slane %v1078_v55, %v3049_v4 }
 0x536   :  { %v1095_v60 = vrot.slane %v1078_v55, %v3060_v9  ;;  %v1103_v10 = vrot.slane %v1078_v55, %v3065_v11  ;;  %v1107_v21 = vrot.slane %v1078_v55, %v3116_v7  ;;  %v1298_v11 = vld [vmem:[%s3826_s6 + $0x190] sm:$0xff] }
 0x537   :  { %2382 = vrcp.f32 %v1099_v56  ;;  %v1302_v7 = vld [vmem:[%s3826_s6 + $0x1b0] sm:$0xff]  ;;  %v2185_v56 = vpack.c.bf16 %v1325_v53, %v1321_v52  ;;  %v1352_v52 = vld [vmem:[%s3826_s6 + $0x340] sm:$0xff] }
 0x538   :  { %2384 = vrcp.f32 %v1083_v58  ;;  %v2239_v39 = vpack.c.bf16 %v1302_v7, %v1298_v11  ;;  %v1320_v58 = vld [vmem:[%s3826_s6 + $0x240] sm:$0xff]  ;;  %v1330_v7 = vld [vmem:[%s3826_s6 + $0x290] sm:$0xff] }
 0x539   :  { %2386 = vrcp.f32 %v1087_v49  ;;  %v1324_v49 = vld [vmem:[%s3826_s6 + $0x260] sm:$0xff] }
 0x53a   :  { %2388 = vrcp.f32 %v1091_v59  ;;  %2240 = vmatpush1.bf16.msra.mxu1 %v2239_v39  ;;  %v1356_v53 = vld [vmem:[%s3826_s6 + $0x360] sm:$0xff] }
 0x53b   :  { %2390 = vrcp.f32 %v1095_v60  ;;  %v2187_v60 = vpack.c.bf16 %v1324_v49, %v1320_v58  ;;  %v1361_v49 = vld [vmem:[%s3826_s6 + $0x388] sm:$0xff] }
 0x53c   :  { %2392 = vrcp.f32 %v1103_v10 }
 0x53d   :  { %2394 = vrcp.f32 %v1107_v21  ;;  %v1331_v21 = vld [vmem:[%s3826_s6 + $0x298] sm:$0xff] }
 0x541   :  { %v2383_v62 = vpop.eup %2382 }
 0x542   :  { %v2385_v5 = vpop.eup %2384  ;;  %v1129_v8 = vmul.f32 %v2383_v62, %v3182_v41  ;;  %v1300_v41 = vld [vmem:[%s3826_s6 + $0x1a0] sm:$0xff]  ;;  %v1322_v62 = vld [vmem:[%s3826_s6 + $0x250] sm:$0xff] }
 0x543   :  { %v1121_v2 = vmul.f32 %v2385_v5, %v3165_v34  ;;  %v2387_v12 = vpop.eup %2386  ;;  %v2175_v34 = vpack.c.bf16 %v1300_v41, %v1296_v24  ;;  %v1326_v5 = vld [vmem:[%s3826_s6 + $0x270] sm:$0xff]  ;;  %v1328_v24 = vld [vmem:[%s3826_s6 + $0x280] sm:$0xff] }
 0x544   :  { %1158 = vperm.xlu0 %2338, %v1129_v8   ;;  %v1123_v22 = vmul.f32 %v2387_v12, %v3170_v17  ;;  %v2389_v23 = vpop.eup %2388  ;;  %v1111_v17 = vrot.slane %v1078_v55, %v3113_v6  ;;  %v1311_v6 = vld [vmem:[%s3826_s6 + $0x1f8] sm:$0xff]  ;;  %v2251_v8 = vpack.c.bf16 %v1326_v5, %v1322_v62  ;;  %v1333_v12 = vld [vmem:[%s3826_s6 + $0x2a8] sm:$0xff]  ;;  %v1332_v41 = vld [vmem:[%s3826_s6 + $0x2a0] sm:$0xff] }
 0x545   :  { %1138 = vperm.xlu1 %2339, %v1121_v2   ;;  %v1125_v25 = vmul.f32 %v2389_v23, %v3175_v37  ;;  %2176 = vmatpush1.bf16.msra.mxu0 %v2175_v34  ;;  %v2391_v31 = vpop.eup %2390  ;;  %v1304_v37 = vld [vmem:[%s3826_s6 + $0x1c0] sm:$0xff]  ;;  %v2241_v16 = vpack.c.bf16 %v1311_v6, %v1307_v29  ;;  %v1329_v2 = vld [vmem:[%s3826_s6 + $0x288] sm:$0xff]  ;;  %v2191_v34 = vpack.c.bf16 %v1332_v41, %v1328_v24  ;;  %v1339_v29 = vld [vmem:[%s3826_s6 + $0x2d8] sm:$0xff] }
 0x546   :  { %v2179_v27 = vpack.c.bf16 %v1308_v14, %v1304_v37  ;;  %2396 = vrcp.f32 %v1111_v17  ;;  %2178 = vmatprep.subr.bf16.mxu0 %v2177_v3  ;;  %v1127_v33 = vmul.f32 %v2391_v31, %v3179_v40  ;;  %v2393_v20 = vpop.eup %2392  ;;  %v1319_v40 = vld [vmem:[%s3826_s6 + $0x238] sm:$0xff]  ;;  %v2189_v23 = vpack.c.bf16 %v1333_v12, %v1329_v2  ;;  %v1334_v17 = vld [vmem:[%s3826_s6 + $0x2b0] sm:$0xff]  ;;  %v1336_v3 = vld [vmem:[%s3826_s6 + $0x2c0] sm:$0xff] }
 0x547   :  { %2242 = vmatprep.subr.bf16.mxu1 %v2241_v16  ;;  %v2245_v46 = vpack.c.bf16 %v1319_v40, %v1315_v15  ;;  %v1131_v51 = vmul.f32 %v2393_v20, %v3185_v18  ;;  %v2395_v55 = vpop.eup %2394  ;;  %v1327_v18 = vld [vmem:[%s3826_s6 + $0x278] sm:$0xff]  ;;  %v2255_v39 = vpack.c.bf16 %v1334_v17, %v1330_v7  ;;  %v2193_v31 = vpack.c.bf16 %v1341_v28, %v1337_v26  ;;  %v1340_v6 = vld [vmem:[%s3826_s6 + $0x2e0] sm:$0xff]  ;;  %v1338_v16 = vld [vmem:[%s3826_s6 + $0x2d0] sm:$0xff] }
 0x548   :  { %2244 = vmatpush1.bf16.msra.mxu1 %v2243_v32  ;;  %v2249_v59 = vpack.c.bf16 %v1327_v18, %v1323_v54  ;;  %v1133_v10 = vmul.f32 %v2395_v55, %v3188_v42  ;;  %v1335_v42 = vld [vmem:[%s3826_s6 + $0x2b8] sm:$0xff]  ;;  %v2195_v14 = vpack.c.bf16 %v1340_v6, %v1336_v3  ;;  %v1349_v32 = vld [vmem:[%s3826_s6 + $0x328] sm:$0xff]  ;;  %v1344_v15 = vld [vmem:[%s3826_s6 + $0x300] sm:$0xff]  ;;  %v2203_v55 = vpack.c.bf16 %v1356_v53, %v1352_v52 }
 0x549   :  { %1143 = vperm.xlu1 %2339, %v1123_v22   ;;  %2180 = vmatpush1.bf16.msra.mxu0 %v2179_v27  ;;  %v2253_v11 = vpack.c.bf16 %v1335_v42, %v1331_v21  ;;  %v1342_v27 = vld [vmem:[%s3826_s6 + $0x2f0] sm:$0xff]  ;;  %v2197_v19 = vpack.c.bf16 %v1349_v32, %v1345_v13  ;;  %v1348_v20 = vld [vmem:[%s3826_s6 + $0x320] sm:$0xff]  ;;  %v1367_v5 = vld [vmem:[%s3826_s6 + $0x3b8] sm:$0xff] }
 0x54a   :  { %2182 = vmatprep.subr.bf16.mxu0 %v2181_v43  ;;  %2246 = vmatprep.subr.bf16.mxu1 %v2245_v46  ;;  %v2259_v30 = vpack.c.bf16 %v1342_v27, %v1338_v16  ;;  %v2199_v40 = vpack.c.bf16 %v1348_v20, %v1344_v15  ;;  %v2263_v46 = vpack.c.bf16 %v1350_v45, %v1346_v44  ;;  %v1358_v18 = vld [vmem:[%s3826_s6 + $0x370] sm:$0xff]  ;;  %v1373_v24 = vld [vmem:[%s3826_s6 + $0x3e8] sm:$0xff]  ;;  %v1371_v41 = vld [vmem:[%s3826_s6 + $0x3d8] sm:$0xff] }
 0x54b   :  { %v1362_v21 = vld [vmem:[%s3826_s6 + $0x390] sm:$0xff]  ;;  %v1368_v17 = vld [vmem:[%s3826_s6 + $0x3c0] sm:$0xff]  ;;  %v208_v3 = vld [vmem:[%s3817_s3 + $0x8] sm:$0xff] }
 0x54c   :  { %2248 = vmatpush1.bf16.msra.mxu1 %v2247_v48  ;;  %v1374_v28 = vld [vmem:[%s3826_s6 + $0x3f0] sm:$0xff]  ;;  %v210_v15 = vld [vmem:[%s3817_s3 + $0x18] sm:$0xff] }
 0x54d   :  { %1148 = vperm.xlu1 %2339, %v1125_v25   ;;  %2184 = vmatpush1.bf16.msra.mxu0 %v2183_v61  ;;  %v1353_v61 = vld [vmem:[%s3826_s6 + $0x348] sm:$0xff]  ;;  %v209_v16 = vld [vmem:[%s3817_s3 + $0x10] sm:$0xff] }
 0x54e   :  { %2186 = vmatprep.subr.bf16.mxu0 %v2185_v56  ;;  %2250 = vmatprep.subr.bf16.mxu1 %v2249_v59  ;;  %v2201_v48 = vpack.c.bf16 %v1357_v63, %v1353_v61  ;;  %v1354_v56 = vld [vmem:[%s3826_s6 + $0x350] sm:$0xff]  ;;  %v1365_v59 = vld [vmem:[%s3826_s6 + $0x3a8] sm:$0xff] }
 0x54f   :  { %v2267_v58 = vpack.c.bf16 %v1358_v18, %v1354_v56  ;;  %v2205_v62 = vpack.c.bf16 %v1365_v59, %v1361_v49  ;;  %v212_v63 = vld [vmem:[%s3817_s3 + $0x28] sm:$0xff]  ;;  %v213_v18 = vld [vmem:[%s3817_s3 + $0x30] sm:$0xff] }
 0x550   :  { %v2397_v22 = vpop.eup %2396  ;;  %2252 = vmatpush1.bf16.msra.mxu1 %v2251_v8  ;;  %v1360_v8 = vld [vmem:[%s3826_s6 + $0x380] sm:$0xff] }
 0x551   :  { %1153 = vperm.xlu1 %2339, %v1127_v33   ;;  %2188 = vmatpush1.bf16.msra.mxu0 %v2187_v60  ;;  %v1135_v25 = vmul.f32 %v2397_v22, %v3191_v36  ;;  %v1343_v36 = vld [vmem:[%s3826_s6 + $0x2f8] sm:$0xff]  ;;  %v1366_v22 = vld [vmem:[%s3826_s6 + $0x3b0] sm:$0xff] }
 0x552   :  { %2190 = vmatprep.subr.bf16.mxu0 %v2189_v23  ;;  %2254 = vmatprep.subr.bf16.mxu1 %v2253_v11  ;;  %v2257_v37 = vpack.c.bf16 %v1343_v36, %v1339_v29  ;;  %v1347_v33 = vld [vmem:[%s3826_s6 + $0x318] sm:$0xff]  ;;  %v1369_v23 = vld [vmem:[%s3826_s6 + $0x3c8] sm:$0xff]  ;;  %v2271_v42 = vpack.c.bf16 %v1366_v22, %v1362_v21  ;;  %v207_v36 = vld [vmem:[%s3817_s3] sm:$0xff] }
 0x553   :  { %v2261_v43 = vpack.c.bf16 %v1351_v38, %v1347_v33  ;;  %v1363_v60 = vld [vmem:[%s3826_s6 + $0x398] sm:$0xff] }
 0x554   :  { %2256 = vmatpush1.bf16.msra.mxu1 %v2255_v39  ;;  %v2269_v2 = vpack.c.bf16 %v1367_v5, %v1363_v60  ;;  %v1375_v11 = vld [vmem:[%s3826_s6 + $0x3f8] sm:$0xff]  ;;  %v1372_v39 = vld [vmem:[%s3826_s6 + $0x3e0] sm:$0xff] }
 0x555   :  { %1163 = vperm.xlu1 %2339, %v1131_v51   ;;  %2192 = vmatpush1.bf16.msra.mxu0 %v2191_v34  ;;  %v1359_v51 = vld [vmem:[%s3826_s6 + $0x378] sm:$0xff]  ;;  %v2209_v34 = vpack.c.bf16 %v1373_v24, %v1369_v23  ;;  %v2273_v7 = vpack.c.bf16 %v1375_v11, %v1371_v41  ;;  %v2211_v26 = vpack.c.bf16 %v1372_v39, %v1368_v17 }
 0x556   :  { %2194 = vmatprep.subr.bf16.mxu0 %v2193_v31  ;;  %2258 = vmatprep.subr.bf16.mxu1 %v2257_v37  ;;  %v2265_v54 = vpack.c.bf16 %v1359_v51, %v1355_v47  ;;  %v214_v21 = vld [vmem:[%s3817_s3 + $0x38] sm:$0xff] }
 0x558   :  { %2260 = vmatpush1.bf16.msra.mxu1 %v2259_v30 }
 0x559   :  { %1168 = vperm.xlu1 %2339, %v1133_v10   ;;  %2196 = vmatpush1.bf16.msra.mxu0 %v2195_v14  ;;  %v1364_v10 = vld [vmem:[%s3826_s6 + $0x3a0] sm:$0xff] }
 0x55a   :  { %2198 = vmatprep.subr.bf16.mxu0 %v2197_v19  ;;  %2262 = vmatprep.subr.bf16.mxu1 %v2261_v43  ;;  %v2207_v12 = vpack.c.bf16 %v1364_v10, %v1360_v8  ;;  %v2410_v19 = vld [vmem:[%s3817_s3 + $0x20] sm:$0xff] }
 0x55c   :  { %2264 = vmatpush1.bf16.msra.mxu1 %v2263_v46 }
 0x55d   :  { %1173 = vperm.xlu1 %2339, %v1135_v25   ;;  %2200 = vmatpush1.bf16.msra.mxu0 %v2199_v40  ;;  %v1370_v25 = vld [vmem:[%s3826_s6 + $0x3d0] sm:$0xff] }
 0x55e   :  { %2202 = vmatprep.subr.bf16.mxu0 %v2201_v48  ;;  %2266 = vmatprep.subr.bf16.mxu1 %v2265_v54  ;;  %v2275_v29 = vpack.c.bf16 %v1374_v28, %v1370_v25 }
 0x560   :  { %2268 = vmatpush1.bf16.msra.mxu1 %v2267_v58 }
 0x561   :  { %2204 = vmatpush1.bf16.msra.mxu0 %v2203_v55  ;;  %2270 = vmatprep.subr.bf16.mxu1 %v2269_v2 }
 0x562   :  { %2206 = vmatprep.subr.bf16.mxu0 %v2205_v62 }
 0x564   :  { %2272 = vmatpush1.bf16.msra.mxu1 %v2271_v42 }
 0x565   :  { %2208 = vmatpush1.bf16.msra.mxu0 %v2207_v12  ;;  %2274 = vmatprep.subr.bf16.mxu1 %v2273_v7 }
 0x566   :  { %2210 = vmatprep.subr.bf16.mxu0 %v2209_v34 }
 0x568   :  { %2276 = vmatpush1.bf16.msra.mxu1 %v2275_v29 }
 0x569   :  { %2212 = vmatpush1.bf16.msra.mxu0 %v2211_v26  ;;  %2309 = vmatprep.subr.bf16.mxu1 %v2412_v35 }
 0x5c3   :  { %v1159_v27 = vpop.permute.xlu0 %1158 }
 0x5c4   :  { %v1139_v31 = vpop.permute.xlu1 %1138  ;;  %v1180_v38 = vmul.f32 %v2410_v19, %v1159_v27 }
 0x5c5   :  { %v1176_v6 = vmul.f32 %v1139_v31, %v207_v36 }
 0x5c6   :  { %v1208_v61 = vrot.slane %v1180_v38, 4 }
 0x5c7   :  { %v1184_v13 = vrot.slane %v1176_v6, 4 }
 0x5c8   :  { %v1144_v37 = vpop.permute.xlu1 %1143  ;;  %v1209_v56 = vadd.f32 %v1208_v61, %v1180_v38 }
 0x5c9   :  { %v1177_v14 = vmul.f32 %v1144_v37, %v208_v3  ;;  %v1185_v40 = vadd.f32 %v1184_v13, %v1176_v6 }
 0x5ca   :  { %v1210_v12 = vrot.slane %v1209_v56, 2 }
 0x5cb   :  { %v1190_v30 = vrot.slane %v1177_v14, 4  ;;  %v1186_v51 = vrot.slane %v1185_v40, 2 }
 0x5cc   :  { %v1149_v32 = vpop.permute.xlu1 %1148  ;;  %v1211_v25 = vadd.f32 %v1210_v12, %v1209_v56  ;;  %v1577_v56 = vld [vmem:[%s3827_s14 + $0x90] sm:$0xff] }
 0x5cd   :  { %v1178_v33 = vmul.f32 %v1149_v32, %v209_v16  ;;  %v1191_v20 = vadd.f32 %v1190_v30, %v1177_v14  ;;  %v1187_v60 = vadd.f32 %v1186_v51, %v1185_v40  ;;  %v1559_v51 = vld [vmem:[%s3827_s14] sm:$0xff] }
 0x5ce   :  { %v1212_v16 = vrot.slane %v1211_v25, 1 }
 0x5cf   :  { %v1196_v43 = vrot.slane %v1178_v33, 4  ;;  %v1192_v47 = vrot.slane %v1191_v20, 2  ;;  %v1188_v24 = vrot.slane %v1187_v60, 1 }
 0x5d0   :  { %v1154_v44 = vpop.permute.xlu1 %1153 }
 0x5d1   :  { %v1197_v45 = vadd.f32 %v1196_v43, %v1178_v33  ;;  %v1179_v46 = vmul.f32 %v1154_v44, %v210_v15  ;;  %v1193_v58 = vadd.f32 %v1192_v47, %v1191_v20  ;;  %v1189_v31 = vadd.f32 %v1188_v24, %v1187_v60  ;;  %v1576_v47 = vld [vmem:[%s3827_s14 + $0x88] sm:$0xff] }
 0x5d2   :  { %v1213_v15 = vadd.f32 %v1212_v16, %v1211_v25  ;;  %v220_v24 = vld [vmem:[%s3828_s13 + $0x28] sm:$0xff]  ;;  %v223_v16 = vld [vmem:[%s3828_s13 + $0x40] sm:$0xff] }
 0x5d3   :  { %v1202_v48 = vrot.slane %v1179_v46, 4  ;;  %v1198_v52 = vrot.slane %v1197_v45, 2  ;;  %v1194_v22 = vrot.slane %v1193_v58, 1 }
 0x5d4   :  { %v1164_v53 = vpop.permute.xlu1 %1163 }
 0x5d5   :  { %v1203_v54 = vadd.f32 %v1202_v48, %v1179_v46  ;;  %v1181_v55 = vmul.f32 %v1164_v53, %v212_v63  ;;  %v1199_v62 = vadd.f32 %v1198_v52, %v1197_v45  ;;  %v1195_v26 = vadd.f32 %v1194_v22, %v1193_v58  ;;  %v1575_v63 = vld [vmem:[%s3827_s14 + $0x80] sm:$0xff]  ;;  %v1560_v52 = vld [vmem:[%s3827_s14 + $0x8] sm:$0xff] }
 0x5d6   :  { %v2277_v48 = vpack.c.bf16 %v1576_v47, %v1575_v63  ;;  %v2279_v53 = vpack.c.bf16 %v1560_v52, %v1559_v51  ;;  %v1564_v22 = vld [vmem:[%s3827_s14 + $0x28] sm:$0xff]  ;;  %v1589_v47 = vld [vmem:[%s3827_s14 + $0xf0] sm:$0xff]  ;;  %v227_v51 = vld [vmem:[%s3828_s13 + $0x60] sm:$0xff] }
 0x5d7   :  { %v1204_v49 = vrot.slane %v1203_v54, 2  ;;  %v1214_v59 = vrot.slane %v1181_v55, 4  ;;  %v1200_v41 = vrot.slane %v1199_v62, 1  ;;  %v1240_v27 = vsel %vm920_vm1, %v1195_v26, %v1189_v31  ;;  %v221_v26 = vld [vmem:[%s3828_s13 + $0x30] sm:$0xff]  ;;  %v228_v52 = vld [vmem:[%s3828_s13 + $0x68] sm:$0xff] }
 0x5d8   :  { %v1169_v5 = vpop.permute.xlu1 %1168  ;;  %2278 = vmatprep.subr.bf16.mxu0 %v2277_v48  ;;  %v1590_v48 = vld [vmem:[%s3827_s14 + $0xf8] sm:$0xff] }
 0x5d9   :  { %v1205_v8 = vadd.f32 %v1204_v49, %v1203_v54  ;;  %v1215_v10 = vadd.f32 %v1214_v59, %v1181_v55  ;;  %v1182_v2 = vmul.f32 %v1169_v5, %v213_v18  ;;  %v1201_v36 = vadd.f32 %v1200_v41, %v1199_v62  ;;  %v216_v54 = vld [vmem:[%s3828_s13 + $0x8] sm:$0xff]  ;;  %v1578_v18 = vld [vmem:[%s3827_s14 + $0x98] sm:$0xff]  ;;  %v1561_v49 = vld [vmem:[%s3827_s14 + $0x10] sm:$0xff] }
 0x5da   :  { %v2281_v58 = vpack.c.bf16 %v1578_v18, %v1577_v56  ;;  %v1562_v59 = vld [vmem:[%s3827_s14 + $0x18] sm:$0xff]  ;;  %v217_v62 = vld [vmem:[%s3828_s13 + $0x10] sm:$0xff]  ;;  %v2328_v56 = vpack.c.bf16 %v228_v52, %v227_v51 }
 0x5db   :  { %v1216_v23 = vrot.slane %v1215_v10, 2  ;;  %v1220_v42 = vrot.slane %v1182_v2, 4  ;;  %v1206_v34 = vrot.slane %v1205_v8, 1  ;;  %v1241_v32 = vsel %vm922_vm2, %v1201_v36, %v1240_v27  ;;  %v218_v5 = vld [vmem:[%s3828_s13 + $0x18] sm:$0xff]  ;;  %v1584_v36 = vld [vmem:[%s3827_s14 + $0xc8] sm:$0xff]  ;;  %v229_v18 = vld [vmem:[%s3828_s13 + $0x70] sm:$0xff] }
 0x5dc   :  { %v1174_v11 = vpop.permute.xlu1 %1173  ;;  %v2283_v60 = vpack.c.bf16 %v1562_v59, %v1561_v49  ;;  %v224_v27 = vld [vmem:[%s3828_s13 + $0x48] sm:$0xff] }
 0x5dd   :  { %v1217_v7 = vadd.f32 %v1216_v23, %v1215_v10  ;;  %v1221_v17 = vadd.f32 %v1220_v42, %v1182_v2  ;;  %v1183_v39 = vmul.f32 %v1174_v11, %v214_v21  ;;  %v1207_v3 = vadd.f32 %v1206_v34, %v1205_v8  ;;  %v1579_v10 = vld [vmem:[%s3827_s14 + $0xa0] sm:$0xff]  ;;  %v1580_v2 = vld [vmem:[%s3827_s14 + $0xa8] sm:$0xff]  ;;  %v1581_v11 = vld [vmem:[%s3827_s14 + $0xb0] sm:$0xff] }
 0x5de   :  { %v2313_v8 = vpack.c.bf16 %v218_v5, %v217_v62  ;;  %v2285_v12 = vpack.c.bf16 %v1580_v2, %v1579_v10  ;;  %v1563_v21 = vld [vmem:[%s3827_s14 + $0x20] sm:$0xff]  ;;  %v1582_v34 = vld [vmem:[%s3827_s14 + $0xb8] sm:$0xff] }
 0x5df   :  { %v1222_v28 = vrot.slane %v1221_v17, 2  ;;  %v1226_v29 = vrot.slane %v1183_v39, 4  ;;  %v1218_v6 = vrot.slane %v1217_v7, 1  ;;  %v1242_v33 = vsel %vm924_vm3, %v1207_v3, %v1241_v32  ;;  %v219_v42 = vld [vmem:[%s3828_s13 + $0x20] sm:$0xff]  ;;  %v1569_v32 = vld [vmem:[%s3827_s14 + $0x50] sm:$0xff] }
 0x5e0   :  { %v1243_v40 = vsel %vm926_vm4, %v1213_v15, %v1242_v33  ;;  %v2287_v23 = vpack.c.bf16 %v1564_v22, %v1563_v21  ;;  %v2316_v41 = vpack.c.bf16 %v220_v24, %v219_v42  ;;  %v1567_v3 = vld [vmem:[%s3827_s14 + $0x40] sm:$0xff]  ;;  %v1570_v33 = vld [vmem:[%s3827_s14 + $0x58] sm:$0xff] }
 0x5e1   :  { %v1223_v37 = vadd.f32 %v1222_v28, %v1221_v17  ;;  %v1227_v14 = vadd.f32 %v1226_v29, %v1183_v39  ;;  %v1219_v19 = vadd.f32 %v1218_v6, %v1217_v7  ;;  %v2289_v7 = vpack.c.bf16 %v1582_v34, %v1581_v11  ;;  %v1565_v17 = vld [vmem:[%s3827_s14 + $0x30] sm:$0xff]  ;;  %v1566_v39 = vld [vmem:[%s3827_s14 + $0x38] sm:$0xff]  ;;  %v1583_v29 = vld [vmem:[%s3827_s14 + $0xc0] sm:$0xff] }
 0x5e2   :  { %v2291_v25 = vpack.c.bf16 %v1566_v39, %v1565_v17  ;;  %v222_v28 = vld [vmem:[%s3828_s13 + $0x38] sm:$0xff]  ;;  %v1568_v6 = vld [vmem:[%s3827_s14 + $0x48] sm:$0xff]  ;;  %v1587_v15 = vld [vmem:[%s3827_s14 + $0xe0] sm:$0xff] }
 0x5e3   :  { %v1224_v30 = vrot.slane %v1223_v37, 1  ;;  %v1228_v13 = vrot.slane %v1227_v14, 2  ;;  %v1244_v45 = vsel %vm928_vm5, %v1219_v19, %v1243_v40  ;;  %v2319_v31 = vpack.c.bf16 %v222_v28, %v221_v26  ;;  %v1588_v40 = vld [vmem:[%s3827_s14 + $0xe8] sm:$0xff]  ;;  %v1376_v62 = vld [vmem:[%s3829_s7] sm:$0xf] }
 0x5e4   :  { %v2322_v19 = vpack.c.bf16 %v224_v27, %v223_v16  ;;  %v1381_v5 = vrot.slane %v1376_v62, %v3035_v0  ;;  %v1385_v2 = vrot.slane %v1376_v62, %v3038_v1  ;;  %v1393_v34 = vrot.slane %v1376_v62, %v3060_v9  ;;  %v1757_v27 = vld [vmem:[%s3831_s15] ss:$0 sm:$0xff] }
 0x5e5   :  { %v1229_v38 = vadd.f32 %v1228_v13, %v1227_v14  ;;  %v1225_v20 = vadd.f32 %v1224_v30, %v1223_v37  ;;  %v2293_v37 = vpack.c.bf16 %v1584_v36, %v1583_v29  ;;  %v2295_v14 = vpack.c.bf16 %v1568_v6, %v1567_v3  ;;  %v1585_v30 = vld [vmem:[%s3827_s14 + $0xd0] sm:$0xff]  ;;  %v1586_v13 = vld [vmem:[%s3827_s14 + $0xd8] sm:$0xff] }
 0x5e6   :  { %v1389_v0 = vrot.slane %v1376_v62, %v3049_v4 }
 0x5e7   :  { %v1230_v43 = vrot.slane %v1229_v38, 1  ;;  %v1245_v46 = vsel %vm930_vm6, %v1225_v20, %v1244_v45  ;;  %v225_v20 = vld [vmem:[%s3828_s13 + $0x50] sm:$0xff]  ;;  %v2301_v45 = vpack.c.bf16 %v1588_v40, %v1587_v15 }
 0x5e9   :  { %v1231_v44 = vadd.f32 %v1230_v43, %v1229_v38  ;;  %v2297_v38 = vpack.c.bf16 %v1586_v13, %v1585_v30  ;;  %v226_v43 = vld [vmem:[%s3828_s13 + $0x58] sm:$0xff] }
 0x5ea   :  { %v2325_v63 = vpack.c.bf16 %v226_v43, %v225_v20 }
 0x5eb   :  { %v1246_v61 = vsel %vm932_vm7, %v1231_v44, %v1245_v46  ;;  %v2299_v44 = vpack.c.bf16 %v1570_v33, %v1569_v32  ;;  %v1571_v46 = vld [vmem:[%s3827_s14 + $0x60] sm:$0xff] }
 0x5ec   :  { %1463 = vmatmul.mubr.f32.vlgmr.msra.gmra.mrb[10].mxu0 %v1246_v61  ;;  %1534 = vmatmul.mubr.f32.vlgmr.msra.gmra.mrb[4].mxu1 %v1246_v61 }
 0x5ed   :  { %1655 = vmatprep.mubr.f32.mxu0 %v1246_v61  ;;  %1962 = vmatprep.mubr.msk.f32.mxu1 %vm2413_vm0, %v2414_v57  ;;  %v215_v57 = vld [vmem:[%s3828_s13] sm:$0xff]  ;;  %v1572_v61 = vld [vmem:[%s3827_s14 + $0x68] sm:$0xff] }
 0x5ee   :  { %2280 = vmatpush3.bf16.msra.mxu0 %v2279_v53  ;;  %v2310_v55 = vpack.c.bf16 %v216_v54, %v215_v57  ;;  %v2303_v53 = vpack.c.bf16 %v1572_v61, %v1571_v46  ;;  %v2305_v57 = vpack.c.bf16 %v1590_v48, %v1589_v47  ;;  %v1573_v54 = vld [vmem:[%s3827_s14 + $0x70] sm:$0xff] }
 0x5ef   :  { %2282 = vmatprep.subr.bf16.mxu0 %v2281_v58  ;;  %v230_v58 = vld [vmem:[%s3828_s13 + $0x78] sm:$0xff] }
 0x5f0   :  { %2311 = vmatpush3.bf16.msra.mxu1 %v2310_v55  ;;  %v1574_v55 = vld [vmem:[%s3827_s14 + $0x78] sm:$0xff]  ;;  %v2331_v59 = vpack.c.bf16 %v230_v58, %v229_v18 }
 0x5f1   :  { %2312 = vmatprep.subr.bf16.mxu1 %v2412_v35  ;;  %v2307_v49 = vpack.c.bf16 %v1574_v55, %v1573_v54 }
 0x5f2   :  { %2284 = vmatpush3.bf16.msra.mxu0 %v2283_v60  ;;  %v2411_v60 = vld [vmem:[%s3819_s0] sm:$0xff] }
 0x5f3   :  { %2286 = vmatprep.subr.bf16.mxu0 %v2285_v12 }
 0x5f4   :  { %2314 = vmatpush3.bf16.msra.mxu1 %v2313_v8 }
 0x5f5   :  { %2315 = vmatprep.subr.bf16.mxu1 %v2412_v35 }
 0x5f6   :  { %2288 = vmatpush3.bf16.msra.mxu0 %v2287_v23 }
 0x5f7   :  { %2290 = vmatprep.subr.bf16.mxu0 %v2289_v7 }
 0x5f8   :  { %2317 = vmatpush3.bf16.msra.mxu1 %v2316_v41 }
 0x5f9   :  { %2318 = vmatprep.subr.bf16.mxu1 %v2412_v35 }
 0x5fa   :  { %2292 = vmatpush3.bf16.msra.mxu0 %v2291_v25 }
 0x5fb   :  { %2294 = vmatprep.subr.bf16.mxu0 %v2293_v37 }
 0x5fc   :  { %2320 = vmatpush3.bf16.msra.mxu1 %v2319_v31 }
 0x5fd   :  { %2321 = vmatprep.subr.bf16.mxu1 %v2412_v35 }
 0x5fe   :  { %2296 = vmatpush3.bf16.msra.mxu0 %v2295_v14 }
 0x5ff   :  { %2298 = vmatprep.subr.bf16.mxu0 %v2297_v38 }
 0x600   :  { %2323 = vmatpush3.bf16.msra.mxu1 %v2322_v19 }
 0x601   :  { %2324 = vmatprep.subr.bf16.mxu1 %v2412_v35 }
 0x602   :  { %2300 = vmatpush3.bf16.msra.mxu0 %v2299_v44 }
 0x603   :  { %2302 = vmatprep.subr.bf16.mxu0 %v2301_v45 }
 0x604   :  { %2326 = vmatpush3.bf16.msra.mxu1 %v2325_v63 }
 0x605   :  { %2327 = vmatprep.subr.bf16.mxu1 %v2412_v35 }
 0x606   :  { %2304 = vmatpush3.bf16.msra.mxu0 %v2303_v53 }
 0x607   :  { %2306 = vmatprep.subr.bf16.mxu0 %v2305_v57 }
 0x608   :  { %2329 = vmatpush3.bf16.msra.mxu1 %v2328_v56 }
 0x609   :  { %2330 = vmatprep.subr.bf16.mxu1 %v2412_v35 }
 0x60a   :  { %2308 = vmatpush3.bf16.msra.mxu0 %v2307_v49 }
 0x60c   :  { %2332 = vmatpush3.bf16.msra.mxu1 %v2331_v59 }
 0x60f   :  { %1963 = vmatmul.mubr.f32.vlgmr.msra.gmra.mrb[6].mxu1 %v2411_v60 }
 0x6bf   :  { %v1464_v8 = vpop.f32.mrb[10].mxu0  ;;  %v1535_v10 = vpop.f32.mrb[4].mxu1 }
 0x6c0   :  { %v1465_v12 = vadd.f32 %v1464_v8, %v1381_v5  ;;  %v1466_v21 = vpop.f32.mrb[11].mxu0  ;;  %v1537_v35 = vpop.f32.mrb[5].mxu1  ;;  %v1536_v1 = vadd.f32 %v1535_v10, %v1389_v0 }
 0x6c1   :  { %v1467_v23 = vadd.f32 %v1466_v21, %v1385_v2  ;;  %v1538_v17 = vadd.f32 %v1537_v35, %v1393_v34 }
 0x6c2   :  { %v1755_v22 = vmul.f32 -1.442695, %v1465_v12 }
 0x6c3   :  { %v1756_v42 = vmul.f32 -1.442695, %v1467_v23 }
 0x6c4   :  { %2398 = vpow2.f32 %v1755_v22 }
 0x6c5   :  { %2400 = vpow2.f32 %v1756_v42 }
 0x6ce   :  { %v2399_v24 = vpop.eup %2398 }
 0x6cf   :  { %v1543_v41 = vadd.f32 1.0, %v2399_v24  ;;  %v2401_v11 = vpop.eup %2400 }
 0x6d0   :  { %v1549_v7 = vadd.f32 1.0, %v2401_v11 }
 0x6d1   :  { %2402 = vrcp.f32 %v1543_v41 }
 0x6d2   :  { %2404 = vrcp.f32 %v1549_v7 }
 0x6db   :  { %v2403_v39 = vpop.eup %2402 }
 0x6dc   :  { %v1552_v25 = vmul.f32 %v2403_v39, %v1538_v17  ;;  %v2405_v28 = vpop.eup %2404 }
 0x6dd   :  { %v1555_v29 = vsub.f32 1.0, %v2405_v28  ;;  %v1557_v3 = vmul.f32 %v2405_v28, %v3085_v50 }
 0x6de   :  { %v1553_v26 = vadd.f32 %v1552_v25, %v1536_v1 }
 0x6e0   :  { %2406 = vtanh.f32 %v1553_v26 }
 0x6e2   :  { %v1727_v4 = vpop.f32.mrb[6].mxu1 }
 0x6e3   :  { %v1964_v9 = vpop.f32.mrb[7].mxu1 }
 0x6ea   :  { %v2407_v31 = vpop.eup %2406 }
 0x6eb   :  { %v1556_v36 = vmul.f32 %v2407_v31, %v1555_v29 }
 0x6ed   :  { %v1558_v6 = vadd.f32 %v1557_v3, %v1556_v36 }
 0x6ef   :  { %1656 = vmatmul.mubr.f32.vlgmr.msra.gmra.mrb[12].mxu0 %v1558_v6  ;;  %1741 = vst [vmem:[%s3830_s17] sm:$0xff] %v1558_v6 }
 0x7c2   :  { %v1831_v37 = vpop.f32.mrb[12].mxu0 }
 0x7c3   :  { %v1832_v14 = vpop.f32.mrb[13].mxu0 }
 0x7c4   :  { %v1833_v16 = vadd.f32 %v1832_v14, %v1831_v37 }
 0x7c6   :  { %v1728_v30 = vadd.f32 %v1833_v16, %v1727_v4 }
 0x7c8   :  { %v1738_v13 = vadd.f32 %v1757_v27, %v1728_v30 }
 0x7ca   :  { %2408 = vtanh.f32 %v1738_v13 }
 0x7d4   :  { %v2409_v32 = vpop.eup %2408 }
 0x7d5   :  { %1740 = vst [vmem:[%s3832_s16] sm:$0xff] %v2409_v32 }

</bundles_post_ra>
